<compile_context>
chip_gen: v7x
topology: tpu7x:2x2x1
jax: 0.10.0
libtpu: 0.0.40
codegen_flags: <defaults>
</compile_context>

<pallas_src>
import math
import functools

import jax
import jax.numpy as jnp
from jax.experimental import pallas as pl
from jax.experimental.pallas import tpu as pltpu


def _cross_attn_kernel(x_ref, w_ref, wqp_ref, wkv_ref, bqp_ref, bkv_ref, o_ref,
                       *, n_head: int):
    """One grid step = one batch element.

    x_ref:   (T, C)    activations for batch b (f32)
    w_ref:   (N, C)    word embeddings for batch b (f32)
    wqp_ref: (C, 2C)   [ Wq^T * 1/sqrt(hd) | Wp^T ]   (compute dtype, resident)
    wkv_ref: (C, 2C)   [ Wk^T | Wv^T ]                (compute dtype, resident)
    bqp_ref: (1, 2C)   [ bq * 1/sqrt(hd) | bp ]       (f32, resident)
    bkv_ref: (1, 2C)   [ bk | bv ]                    (f32, resident)
    o_ref:   (T, C)
    """
    T, C = x_ref.shape
    N = w_ref.shape[0]
    hd = C // n_head

    w_qp = wqp_ref[...]                       # (C, 2C)  compute dtype
    w_kv = wkv_ref[...]                       # (C, 2C)
    b_qp = bqp_ref[...]                       # (1, 2C)  f32
    b_kv = bkv_ref[...]                       # (1, 2C)  f32

    cdt = w_qp.dtype                          # compute dtype (f32 or bf16)
    use_approx = cdt != jnp.float32           # EUP reciprocal on the fast path

    # Single full-tile casts (nothing cast per-slice).
    xc = x_ref[...].astype(cdt)               # (T, C)
    wc = w_ref[...].astype(cdt)               # (N, C)

    # Projections (scale already folded into Wq/bq); K and V from ONE matmul.
    # f32 accumulation regardless of compute dtype.
    q = jnp.dot(xc, w_qp[:, :C], preferred_element_type=jnp.float32) + b_qp[:, :C]
    kv = jnp.dot(wc, w_kv, preferred_element_type=jnp.float32) + b_kv
    k = kv[:, :C]
    v = kv[:, C:]

    # Multi-head attention for this batch: one contraction over all heads.
    qh = q.astype(cdt).reshape(T, n_head, hd)
    kh = k.astype(cdt).reshape(N, n_head, hd)
    vh = v.reshape(N, n_head, hd)             # stays f32 for P@V

    # att[h, t, n] = q[t, h, :] . k[n, h, :]   (scale pre-folded)
    att = jnp.einsum('thd,nhd->htn', qh, kh,
                     preferred_element_type=jnp.float32)

    # Numerically-stable softmax over the word_emb axis (f32 statistics,
    # probabilities kept f32 into the value contraction).
    att = att - jnp.max(att, axis=-1, keepdims=True)
    att = jnp.exp(att)
    att = att * pl.reciprocal(jnp.sum(att, axis=-1, keepdims=True),
                              approx=use_approx)

    # y[t, h, :] = sum_n att[h, t, n] * v[n, h, :]
    y = jnp.einsum('htn,nhd->thd', att, vh,
                   preferred_element_type=jnp.float32).reshape(T, C)

    # Output projection.
    out = jnp.dot(y.astype(cdt), w_qp[:, C:],
                  preferred_element_type=jnp.float32) + b_qp[:, C:]
    o_ref[...] = out.astype(o_ref.dtype)


def pack_cross_attention_params(params, n_head: int, compute_dtype=jnp.float32):
    """One-time host-side packing (call once; NOT in the per-call path).

    params: 'wq','wk','wv','wp' of shape (C, C) in PyTorch Linear layout
            (out x in) and 'bq','bk','bv','bp' of shape (C,).
    """
    C = params['wq'].shape[0]
    hd = C // n_head
    scale = 1.0 / math.sqrt(hd)
    # Pre-transposed slabs; attention scale folded into the Q half.
    w_qp = jnp.concatenate([params['wq'].T * scale, params['wp'].T], axis=1)
    w_kv = jnp.concatenate([params['wk'].T, params['wv'].T], axis=1)
    b_qp = jnp.concatenate([params['bq'] * scale, params['bp']]).reshape(1, 2 * C)
    b_kv = jnp.concatenate([params['bk'], params['bv']]).reshape(1, 2 * C)
    return {
        'w_qp': w_qp.astype(compute_dtype),   # (C, 2C)
        'w_kv': w_kv.astype(compute_dtype),   # (C, 2C)
        'b_qp': b_qp.astype(jnp.float32),     # (1, 2C)  biases stay f32
        'b_kv': b_kv.astype(jnp.float32),     # (1, 2C)
        'n_head': n_head,
    }


def _default_vmem_limit_bytes():
    # ~75% of physical VMEM, capped at 96 MiB: ~96 MiB on v5e/v6e (128 MiB
    # physical), ~48 MiB on v7x (64 MiB physical).  Conservative 48 MiB
    # fallback if the hardware query is unavailable.
    try:
        cap = pltpu.get_tpu_info().vmem_capacity_bytes
    except Exception:
        cap = 64 * 1024 * 1024
    return min(int(cap * 0.75), 96 * 1024 * 1024)


def cross_attention(x, word_emb, packed_params):
    """Pallas TPU CrossAttention forward (eval mode).

    x:        (B, T, C) float32
    word_emb: (B, N, C) float32
    packed_params: output of pack_cross_attention_params.
    """
    B, T, C = x.shape
    _, N, _ = word_emb.shape
    n_head = packed_params['n_head']
    assert C % n_head == 0

    kernel = functools.partial(_cross_attn_kernel, n_head=n_head)

    const2d = lambda b: (0, 0)   # weights / biases: same block every step → resident

    grid_spec = pltpu.PrefetchScalarGridSpec(
        num_scalar_prefetch=0,
        grid=(B,),
        in_specs=[
            pl.BlockSpec((None, T, C), lambda b: (b, 0, 0)),   # x:        per-batch tile
            pl.BlockSpec((None, N, C), lambda b: (b, 0, 0)),   # word_emb: per-batch tile
            pl.BlockSpec((C, 2 * C), const2d),                 # [Wq*s | Wp]
            pl.BlockSpec((C, 2 * C), const2d),                 # [Wk | Wv]
            pl.BlockSpec((1, 2 * C), const2d),                 # [bq*s | bp]
            pl.BlockSpec((1, 2 * C), const2d),                 # [bk | bv]
        ],
        out_specs=pl.BlockSpec((None, T, C), lambda b: (b, 0, 0)),
    )

    return pl.pallas_call(
        kernel,
        out_shape=jax.ShapeDtypeStruct((B, T, C), x.dtype),
        grid_spec=grid_spec,
        compiler_params=pltpu.CompilerParams(
            # Batch axis is independent -> pipeline across steps + shard over
            # both TensorCores on v7x.
            dimension_semantics=("parallel",),
            vmem_limit_bytes=_default_vmem_limit_bytes()),
    )(x, word_emb,
      packed_params['w_qp'], packed_params['w_kv'],
      packed_params['b_qp'], packed_params['b_kv'])


def _init_params(key, embed_dim):
    # Deterministic synthetic init (roughly PyTorch Linear's U(-1/sqrt(C), 1/sqrt(C))).
    ks = jax.random.split(key, 8)
    bound = 1.0 / math.sqrt(embed_dim)
    u = lambda k, shape: jax.random.uniform(k, shape, jnp.float32, -bound, bound)
    return {
        'wk': u(ks[0], (embed_dim, embed_dim)), 'bk': u(ks[1], (embed_dim,)),
        'wq': u(ks[2], (embed_dim, embed_dim)), 'bq': u(ks[3], (embed_dim,)),
        'wv': u(ks[4], (embed_dim, embed_dim)), 'bv': u(ks[5], (embed_dim,)),
        'wp': u(ks[6], (embed_dim, embed_dim)), 'bp': u(ks[7], (embed_dim,)),
    }


def _reference(x, word_emb, params, n_head):
    # Pure-JAX f32 reference (eval mode, dropout = identity) mirroring PyTorch.
    B, T, C = x.shape
    _, N, _ = word_emb.shape
    hd = C // n_head
    q = x @ params['wq'].T + params['bq']
    k = word_emb @ params['wk'].T + params['bk']
    v = word_emb @ params['wv'].T + params['bv']
    q = q.reshape(B, T, n_head, hd).transpose(0, 2, 1, 3)
    k = k.reshape(B, N, n_head, hd).transpose(0, 2, 1, 3)
    v = v.reshape(B, N, n_head, hd).transpose(0, 2, 1, 3)
    att = (q @ k.transpose(0, 1, 3, 2)) * (1.0 / math.sqrt(hd))
    att = jax.nn.softmax(att, axis=-1)
    y = att @ v
    y = y.transpose(0, 2, 1, 3).reshape(B, T, C)
    return y @ params['wp'].T + params['bp']


if __name__ == "__main__":
    B, T, N = 2, 16, 8          # batch, query seq (block_size), word_emb seq
    embed_dim, n_head = 32, 8   # embed_dim % 8 == 0

    key = jax.random.PRNGKey(0)
    k_x, k_w, k_p = jax.random.split(key, 3)
    x = jax.random.normal(k_x, (B, T, embed_dim), jnp.float32)
    word_emb = jax.random.normal(k_w, (B, N, embed_dim), jnp.float32)
    params = _init_params(k_p, embed_dim)
    ref = _reference(x, word_emb, params, n_head)

    # 1) Full-precision path: parity with the (f32) PyTorch module.
    packed_f32 = pack_cross_attention_params(params, n_head, jnp.float32)
    out_f32 = jax.block_until_ready(cross_attention(x, word_emb, packed_f32))
    assert out_f32.shape == (B, T, embed_dim)
    assert jnp.allclose(out_f32, ref, atol=1e-3, rtol=1e-3), \
        "f32 kernel mismatch vs reference"

    # 2) bf16 compute path: bf16 matmul operands, f32 accumulation, f32
    #    softmax statistics and f32 probabilities into P@V.
    packed_bf16 = pack_cross_attention_params(params, n_head, jnp.bfloat16)
    out_bf16 = jax.block_until_ready(cross_attention(x, word_emb, packed_bf16))
    assert out_bf16.shape == (B, T, embed_dim)
    assert jnp.allclose(out_bf16, ref, atol=5e-2, rtol=5e-2), \
        "bf16 kernel mismatch vs reference"

    print("KERNEL_OK")
</pallas_src>

<mosaic_0001>
module attributes {stable_mosaic.version = 11 : i64} {
  func.func @_cross_attn_kernel(%arg0: i32, %arg1: memref<1x16x32xf32, #tpu.memory_space<vmem>>, %arg2: memref<1x8x32xf32, #tpu.memory_space<vmem>>, %arg3: memref<32x64xf32, #tpu.memory_space<vmem>>, %arg4: memref<32x64xf32, #tpu.memory_space<vmem>>, %arg5: memref<1x64xf32, #tpu.memory_space<vmem>>, %arg6: memref<1x64xf32, #tpu.memory_space<vmem>>, %arg7: memref<1x16x32xf32, #tpu.memory_space<vmem>>) attributes {dimension_semantics = [#tpu.dimension_semantics<parallel>], iteration_bounds = array<i64: 2>, scalar_prefetch = 0 : i64, scratch_operands = 0 : i64, tpu.core_type = #tpu.core_type<tc>, window_params = [{transform_indices = @transform_0, window_bounds = array<i64: 1, 16, 32>}, {transform_indices = @transform_1, window_bounds = array<i64: 1, 8, 32>}, {pipeline_mode = #tpu.pipeline_mode<synchronous>, transform_indices = @transform_2, window_bounds = array<i64: 32, 64>}, {pipeline_mode = #tpu.pipeline_mode<synchronous>, transform_indices = @transform_3, window_bounds = array<i64: 32, 64>}, {pipeline_mode = #tpu.pipeline_mode<synchronous>, transform_indices = @transform_4, window_bounds = array<i64: 1, 64>}, {pipeline_mode = #tpu.pipeline_mode<synchronous>, transform_indices = @transform_5, window_bounds = array<i64: 1, 64>}, {transform_indices = @transform_6, window_bounds = array<i64: 1, 16, 32>}]} {
    %c0 = arith.constant 0 : index
    %c0_0 = arith.constant 0 : index
    %0 = vector.load %arg3[%c0, %c0_0] : memref<32x64xf32, #tpu.memory_space<vmem>>, vector<32x64xf32>
    %c0_1 = arith.constant 0 : index
    %c0_2 = arith.constant 0 : index
    %1 = vector.load %arg4[%c0_1, %c0_2] : memref<32x64xf32, #tpu.memory_space<vmem>>, vector<32x64xf32>
    %c0_3 = arith.constant 0 : index
    %c0_4 = arith.constant 0 : index
    %2 = vector.load %arg5[%c0_3, %c0_4] : memref<1x64xf32, #tpu.memory_space<vmem>>, vector<1x64xf32>
    %c0_5 = arith.constant 0 : index
    %c0_6 = arith.constant 0 : index
    %3 = vector.load %arg6[%c0_5, %c0_6] : memref<1x64xf32, #tpu.memory_space<vmem>>, vector<1x64xf32>
    %c0_7 = arith.constant 0 : index
    %c0_8 = arith.constant 0 : index
    %c0_9 = arith.constant 0 : index
    %4 = vector.load %arg1[%c0_7, %c0_8, %c0_9] : memref<1x16x32xf32, #tpu.memory_space<vmem>>, vector<1x16x32xf32>
    %5 = vector.shape_cast %4 : vector<1x16x32xf32> to vector<16x32xf32>
    %c0_10 = arith.constant 0 : index
    %c0_11 = arith.constant 0 : index
    %c0_12 = arith.constant 0 : index
    %6 = vector.load %arg2[%c0_10, %c0_11, %c0_12] : memref<1x8x32xf32, #tpu.memory_space<vmem>>, vector<1x8x32xf32>
    %7 = vector.shape_cast %6 : vector<1x8x32xf32> to vector<8x32xf32>
    %8 = vector.extract_strided_slice %0 {offsets = [0, 0], sizes = [32, 32], strides = [1, 1]} : vector<32x64xf32> to vector<32x32xf32>
    %cst = arith.constant dense<0.000000e+00> : vector<16x32xf32>
    %9 = tpu.matmul %5, %8, %cst {dimension_numbers = #tpu.dot_dimension_numbers<[1], [0], [0], [1], [0, 0, 1, 1], [], []>} : vector<16x32xf32>, vector<32x32xf32>, vector<16x32xf32> -> vector<16x32xf32>
    %10 = vector.extract_strided_slice %2 {offsets = [0, 0], sizes = [1, 32], strides = [1, 1]} : vector<1x64xf32> to vector<1x32xf32>
    %11 = vector.broadcast %10 : vector<1x32xf32> to vector<16x32xf32>
    %12 = arith.addf %9, %11 : vector<16x32xf32>
    %cst_13 = arith.constant dense<0.000000e+00> : vector<8x64xf32>
    %13 = tpu.matmul %7, %1, %cst_13 {dimension_numbers = #tpu.dot_dimension_numbers<[1], [0], [0], [1], [0, 0, 1, 1], [], []>} : vector<8x32xf32>, vector<32x64xf32>, vector<8x64xf32> -> vector<8x64xf32>
    %14 = vector.broadcast %3 : vector<1x64xf32> to vector<8x64xf32>
    %15 = arith.addf %13, %14 : vector<8x64xf32>
    %16 = vector.extract_strided_slice %15 {offsets = [0, 0], sizes = [8, 32], strides = [1, 1]} : vector<8x64xf32> to vector<8x32xf32>
    %17 = vector.extract_strided_slice %15 {offsets = [0, 32], sizes = [8, 32], strides = [1, 1]} : vector<8x64xf32> to vector<8x32xf32>
    %18 = vector.shape_cast %12 : vector<16x32xf32> to vector<16x8x4xf32>
    %19 = vector.shape_cast %16 : vector<8x32xf32> to vector<8x8x4xf32>
    %20 = vector.shape_cast %17 : vector<8x32xf32> to vector<8x8x4xf32>
    "tpu.trace_start"() <{level = 10 : i32, message = "thd,nhd->htn"}> : () -> ()
    %cst_14 = arith.constant dense<0.000000e+00> : vector<8x16x8xf32>
    %21 = tpu.matmul %18, %19, %cst_14 {dimension_numbers = #tpu.dot_dimension_numbers<[2], [2], [0], [0], [0, 1, 0, 0, 1, 0], [1], [1]>} : vector<16x8x4xf32>, vector<8x8x4xf32>, vector<8x16x8xf32> -> vector<8x16x8xf32>
    "tpu.trace_stop"() : () -> ()
    %cst_15 = arith.constant dense<0xFF800000> : vector<8x16xf32>
    %22 = vector.multi_reduction <maximumf>, %21, %cst_15 [2] : vector<8x16x8xf32> to vector<8x16xf32>
    %23 = vector.shape_cast %22 : vector<8x16xf32> to vector<8x16x1xf32>
    %24 = vector.broadcast %23 : vector<8x16x1xf32> to vector<8x16x8xf32>
    %25 = arith.subf %21, %24 : vector<8x16x8xf32>
    %26 = math.exp %25 : vector<8x16x8xf32>
    %cst_16 = arith.constant dense<0.000000e+00> : vector<8x16xf32>
    %27 = vector.multi_reduction <add>, %26, %cst_16 [2] : vector<8x16x8xf32> to vector<8x16xf32>
    %28 = vector.shape_cast %27 : vector<8x16xf32> to vector<8x16x1xf32>
    %29 = tpu.reciprocal %28 : vector<8x16x1xf32> -> vector<8x16x1xf32>
    %30 = vector.broadcast %29 : vector<8x16x1xf32> to vector<8x16x8xf32>
    %31 = arith.mulf %26, %30 : vector<8x16x8xf32>
    "tpu.trace_start"() <{level = 10 : i32, message = "htn,nhd->thd"}> : () -> ()
    %cst_17 = arith.constant dense<0.000000e+00> : vector<8x4x16xf32>
    %32 = tpu.matmul %20, %31, %cst_17 {dimension_numbers = #tpu.dot_dimension_numbers<[0], [2], [2], [1], [0, 1, 0, 2, 1, 1], [1], [0]>} : vector<8x8x4xf32>, vector<8x16x8xf32>, vector<8x4x16xf32> -> vector<8x4x16xf32>
    %33 = tpu.transpose %32, [2, 0, 1] : vector<8x4x16xf32> -> vector<16x8x4xf32>
    "tpu.trace_stop"() : () -> ()
    %34 = vector.shape_cast %33 : vector<16x8x4xf32> to vector<16x32xf32>
    %35 = vector.extract_strided_slice %0 {offsets = [0, 32], sizes = [32, 32], strides = [1, 1]} : vector<32x64xf32> to vector<32x32xf32>
    %cst_18 = arith.constant dense<0.000000e+00> : vector<16x32xf32>
    %36 = tpu.matmul %34, %35, %cst_18 {dimension_numbers = #tpu.dot_dimension_numbers<[1], [0], [0], [1], [0, 0, 1, 1], [], []>} : vector<16x32xf32>, vector<32x32xf32>, vector<16x32xf32> -> vector<16x32xf32>
    %37 = vector.extract_strided_slice %2 {offsets = [0, 32], sizes = [1, 32], strides = [1, 1]} : vector<1x64xf32> to vector<1x32xf32>
    %38 = vector.broadcast %37 : vector<1x32xf32> to vector<16x32xf32>
    %39 = arith.addf %36, %38 : vector<16x32xf32>
    %c0_19 = arith.constant 0 : index
    %c0_20 = arith.constant 0 : index
    %c0_21 = arith.constant 0 : index
    %40 = vector.load %arg7[%c0_19, %c0_20, %c0_21] : memref<1x16x32xf32, #tpu.memory_space<vmem>>, vector<1x16x32xf32>
    %41 = vector.shape_cast %40 : vector<1x16x32xf32> to vector<16x32xf32>
    %42 = vector.shape_cast %39 : vector<16x32xf32> to vector<1x16x32xf32>
    tpu.vector_store %arg7[%c0_19, %c0_20, %c0_21], %42 {strides = array<i32>} : memref<1x16x32xf32, #tpu.memory_space<vmem>>, vector<1x16x32xf32>,
    return
  }
  func.func @transform_0(%arg0: i32) -> (i32, i32, i32) {
    %c0_i32 = arith.constant 0 : i32
    %c0_i32_0 = arith.constant 0 : i32
    %c0_i32_1 = arith.constant 0 : i32
    return %arg0, %c0_i32, %c0_i32_0 : i32, i32, i32
  }
  func.func @transform_1(%arg0: i32) -> (i32, i32, i32) {
    %c0_i32 = arith.constant 0 : i32
    %c0_i32_0 = arith.constant 0 : i32
    %c0_i32_1 = arith.constant 0 : i32
    return %arg0, %c0_i32, %c0_i32_0 : i32, i32, i32
  }
  func.func @transform_2(%arg0: i32) -> (i32, i32) {
    %c0_i32 = arith.constant 0 : i32
    %c0_i32_0 = arith.constant 0 : i32
    %c0_i32_1 = arith.constant 0 : i32
    return %c0_i32, %c0_i32_0 : i32, i32
  }
  func.func @transform_3(%arg0: i32) -> (i32, i32) {
    %c0_i32 = arith.constant 0 : i32
    %c0_i32_0 = arith.constant 0 : i32
    %c0_i32_1 = arith.constant 0 : i32
    return %c0_i32, %c0_i32_0 : i32, i32
  }
  func.func @transform_4(%arg0: i32) -> (i32, i32) {
    %c0_i32 = arith.constant 0 : i32
    %c0_i32_0 = arith.constant 0 : i32
    %c0_i32_1 = arith.constant 0 : i32
    return %c0_i32, %c0_i32_0 : i32, i32
  }
  func.func @transform_5(%arg0: i32) -> (i32, i32) {
    %c0_i32 = arith.constant 0 : i32
    %c0_i32_0 = arith.constant 0 : i32
    %c0_i32_1 = arith.constant 0 : i32
    return %c0_i32, %c0_i32_0 : i32, i32
  }
  func.func @transform_6(%arg0: i32) -> (i32, i32, i32) {
    %c0_i32 = arith.constant 0 : i32
    %c0_i32_0 = arith.constant 0 : i32
    %c0_i32_1 = arith.constant 0 : i32
    return %arg0, %c0_i32, %c0_i32_0 : i32, i32, i32
  }
}

</mosaic_0001>

<bundles_post_ra>
// kernel: tpu_custom_call.1
= control target key start
LH: loop header
LB: loop body
LE: loop exit
PB: predicated region body
PF: predicated region fallthrough
CT: control target
= control target key end

     0   :  { %s5190_s0 = inlined_call_operand.hbm [shape: f32[2,16,32], index: 0, kind: input, shape index: {}]   ;;  %s5191_s1 = inlined_call_operand.hbm [shape: f32[2,8,32], index: 1, kind: input, shape index: {}]   ;;  %s5192_s2 = inlined_call_operand.hbm [shape: f32[32,64], index: 2, kind: input, shape index: {}]   ;;  %s5193_s3 = inlined_call_operand.hbm [shape: f32[32,64], index: 3, kind: input, shape index: {}]   ;;  %s5194_s4 = inlined_call_operand.vmem [shape: f32[1,64], index: 4, kind: input, shape index: {}]   ;;  %s5195_s5 = inlined_call_operand.vmem [shape: f32[1,64], index: 5, kind: input, shape index: {}]   ;;  %s5196_s6 = inlined_call_operand.hbm [shape: f32[2,16,32], index: 6, kind: output, shape index: {}]  }
   0x1   :  { %5203 = sst [smem:[#allocation17_spill]] %s5190_s0 }
   0x2   :  { %5204 = sst [smem:[#allocation18_spill]] %s5192_s2 }
   0x3   :  { %5205 = sst [smem:[#allocation19_spill]] %s5193_s3 }
   0x4   :  { %11 = vsyncpa [#allocation3], 0 }
   0x5   :  { %13 = vsyncpa [#allocation3 + $0x1], 0 }
   0x6   :  { %14 = vsyncpa [#allocation6], 0 }
   0x7   :  { %16 = vsyncpa [#allocation6 + $0x1], 0 }
   0x8   :  { %17 = vsyncpa [#allocation9], 0 }
   0x9   :  { %18 = vsyncpa [#allocation4], 0 }
   0xa   :  { %20 = vsyncpa [#allocation4 + $0x1], 0  ;;  %s4448_s21 = smov 0   ;;  %s4450_s22 = smov 0  }
   0xb   :  { %s4452_s23 = smov 0   ;;  %s4454_s24 = smov 0  }
   0xc LB: > { %s4469_s25 = sadd.s32 4294967295, %s4383_s24   ;;  %s3677_s26 = sadd.s32 4294967294, %s4383_s24   ;;  %s4383_s24 = sphi %s4454_s24, %s5235_s24   ;;  %s4379_s23 = sphi %s4452_s23, %s5234_s23   ;;  %s4375_s22 = sphi %s4450_s22, %s5233_s22   ;;  %s4371_s21 = sphi %s4448_s21, %s5232_s21  }
   0xd   : > { %p46_p0 = scmp.ne.s32.totalorder %s4375_s22, %s4371_s21  ;;  %p5197_p1 = scmp.eq.s32.totalorder %s4469_s25, 0 }
   0xe   : > { %p186_p3 = scmp.eq.s32.totalorder %s3677_s26, 1  ;;  %p3678_p5 = scmp.ge.s32.totalorder %s4383_s24, 1 }
   0xf   : > { %p4478_p4 = por %p5197_p1, %p46_p0  ;;  %p193_p7 = scmp.lt.s32.totalorder %s4383_s24, 3 }
  0x10   : > { %p4483_p6 = por %p186_p3, %p46_p0  ;;  %s4385_s30 = smov [#allocation7]  }
  0x11   : > { %s5206_s27 = scalar_select %p4478_p4, 1, 0 }
  0x12   : > { %s5207_s28 = scalar_select %p4483_p6, 1, 0 }
  0x13   : > { %p4488_p8 = pnand %p3678_p5, %p193_p7  ;;  %s205_s7 = sshll.u32 %s4385_s30, 4  ;;  %s4492_s7 = int_to_ptr.vmem [resolvable:$true] %s205_s7 }
  0x14   : > { %s4386_s9 = smov [#allocation8]   ;;  %s5210_s2 = sld [smem:[#allocation18_spill]] }
  0x15   : > { %s5208_s29 = scalar_select %p4488_p8, 1, 0 }
  0x16   : > { %p4033_p9 = pneg %p4488_p8  ;;  %s218_s10 = sshll.u32 %s4386_s9, 4  ;;  %s4503_s10 = int_to_ptr.vmem [resolvable:$true] %s218_s10 }
  0x18   : > { %p4499_p11 = pnand %p4033_p9, %p5197_p1 }
  0x1a   : > { %s4189_s13 = scalar_lea.hbm %s5210_s2, 512  ;;  %p4191_p13 = pneg %p4499_p11 }
  0x1b   : > { %p4190_p12 = scmp.ne.s32.totalorder %s5210_s2, %s4189_s13  ;;  %p4196_p5 = scmp.lt.u32.totalorder %s4189_s13, %s5210_s2 }
  0x1d   : > { %p4192_p0 = pnand %p4191_p13, %p4190_p12 }
  0x1f   : > { %p4193_p3 = pneg %p4192_p0 }
  0x21   : > { %p4198_p7 = pnand %p4196_p5, %p4193_p3 }
  0x23   : > { %4201 = shalt.err (!%p4198_p7)
}
  0x24   : > { %s4202_s18 = scalar_lea.vmem %s4492_s7, 512  ;;  %p4210_p2 = scmp.lt.s32.totalorder %s4492_s7, %s4492_s7 }
  0x25   : > { %p4203_p9 = scmp.ne.s32.totalorder %s4492_s7, %s4202_s18  ;;  %p4211_p12 = scmp.lt.s32.totalorder %s4202_s18, %s4202_s18 }
  0x27   : > { %p4205_p10 = pnand %p4203_p9, %p4191_p13  ;;  %p4212_p0 = por %p4211_p12, %p4210_p2 }
  0x29   : > { %p4206_p1 = pneg %p4205_p10 }
  0x2b   : > { %p4213_p6 = pnand %p4212_p0, %p4206_p1 }
  0x2d   : > { %4216 = shalt.err (!%p4213_p6)
}
  0x2e   : > { %s5198_s19 = smov 128   ;;  %s5199_s20 = smov 8  }
  0x2f   : > { %4036 = dma.hbm_to_vmem [thread:$0]  (!%p4499_p11), %s5210_s2, 512, %s4492_s7, [#allocation6], %s5198_s19, %s5198_s19, %s5199_s20  }
  0x30   : > { %s5211_s3 = sld [smem:[#allocation19_spill]] }
  0x36   : > { %s4217_s12 = scalar_lea.hbm %s5211_s3, 512 }
  0x37   : > { %p4218_p1 = scmp.ne.s32.totalorder %s5211_s3, %s4217_s12  ;;  %p4224_p10 = scmp.lt.u32.totalorder %s4217_s12, %s5211_s3 }
  0x39   : > { %p4220_p2 = pnand %p4218_p1, %p4191_p13 }
  0x3b   : > { %p4221_p6 = pneg %p4220_p2 }
  0x3d   : > { %p4226_p3 = pnand %p4224_p10, %p4221_p6 }
  0x3f   : > { %4229 = shalt.err (!%p4226_p3)
}
  0x40   : > { %s4230_s7 = scalar_lea.vmem %s4503_s10, 512  ;;  %p4238_p12 = scmp.lt.s32.totalorder %s4503_s10, %s4503_s10 }
  0x41   : > { %p4231_p5 = scmp.ne.s32.totalorder %s4503_s10, %s4230_s7  ;;  %p4239_p0 = scmp.lt.s32.totalorder %s4230_s7, %s4230_s7 }
  0x43   : > { %p4233_p7 = pnand %p4231_p5, %p4191_p13  ;;  %p4240_p1 = por %p4239_p0, %p4238_p12 }
  0x45   : > { %p4234_p9 = pneg %p4233_p7 }
  0x47   : > { %p4241_p2 = pnand %p4240_p1, %p4234_p9 }
  0x49   : > { %4244 = shalt.err (!%p4241_p2)
}
  0x4a   : > { %4039 = dma.hbm_to_vmem [thread:$0]  (!%p4499_p11), %s5211_s3, 512, %s4503_s10, [#allocation9], %s5198_s19, %s5198_s19, %s5199_s20  }
  0x4b   : > { %s4564_s8 = sadd.s32 1, %s4383_s24   ;;  %s33_s26 = sadd.s32 1, %s4379_s23 }
  0x4c   : > { %s30_s30 = ssub.s32 %s4383_s24, %s4564_s8  ;;  %p40_p13 = scmp.ne.s32.totalorder %s4379_s23, %s4375_s22 }
  0x4d   : > { %p31_p6 = scmp.eq.s32.totalorder %s30_s30, 0  ;;  %p41_p10 = scmp.eq.s32.totalorder %s4383_s24, 0 }
  0x4e   : > { %p5212_p3 = scmp.eq.s32.totalorder %s4469_s25, 1  ;;  %p4053_p7 = scmp.lt.s32.totalorder %s4383_s24, 2 }
  0x4f   : > { %s4580_s11 = scalar_select %p31_p6, %s4379_s23, %s33_s26  }
  0x50   : > { %p4574_p5 = por %p5212_p3, %p40_p13  ;;  %p42_p9 = por %p41_p10, %p40_p13 }
  0x51   : > { %5214 = sst [smem:[#allocation16_spill]] %s4580_s11  ;;  %s4583_s12 = sand.u32 1, %s4379_s23  }
  0x52   : > { %s5213_s9 = scalar_select %p4574_p5, 1, 0 }
  0x53   : > { %s3682_s10 = sshll.u32 %s4583_s12, 4  ;;  %s3769_s13 = sshll.u32 %s4383_s24, 8 }
  0x54   : > { %s5215_s0 = sld [smem:[#allocation17_spill]]  ;;  %s242_s7 = scalar_lea.vmem [#allocation2], %s3682_s10 }
  0x55   : > { %s249_s17 = sshll.u32 %s242_s7, 4  ;;  %p4594_p11 = pnand %p4053_p7, %p42_p9  ;;  %s4592_s17 = int_to_ptr.vmem [resolvable:$true] %s249_s17 }
  0x56   : > { %s3685_s30 = sshll.u32 %s4583_s12, 3  ;;  %s239_s19 = scalar_lea.sflag [#allocation3], %s4583_s12 }
  0x57   : > { %p4247_p0 = pneg %p4594_p11 }
  0x5a   : > { %s4590_s16 = scalar_lea.hbm %s5215_s0, %s3769_s13  ;;  %s4250_s15 = scalar_lea.hbm %s5215_s0, 512 }
  0x5b   : > { %s4245_s14 = scalar_lea.hbm %s4590_s16, 256  ;;  %p4251_p13 = scmp.lt.u32.totalorder %s4590_s16, %s5215_s0 }
  0x5c   : > { %p4246_p12 = scmp.ne.s32.totalorder %s4590_s16, %s4245_s14  ;;  %p4252_p6 = scmp.lt.u32.totalorder %s4250_s15, %s4245_s14 }
  0x5d   : > { %p4254_p3 = scmp.lt.u32.totalorder %s4245_s14, %s4590_s16 }
  0x5e   : > { %p4248_p1 = pnand %p4247_p0, %p4246_p12  ;;  %p4253_p10 = por %p4252_p6, %p4251_p13 }
  0x60   : > { %p4249_p2 = pneg %p4248_p1  ;;  %p4255_p7 = por %p4254_p3, %p4253_p10 }
  0x62   : > { %p4256_p9 = pnand %p4255_p7, %p4249_p2 }
  0x64   : > { %4259 = shalt.err (!%p4256_p9)
}
  0x65   : > { %s4260_s26 = scalar_lea.vmem %s4592_s17, 256  ;;  %s4389_s10 = smov [#allocation2]  }
  0x66   : > { %p4261_p12 = scmp.ne.s32.totalorder %s4592_s17, %s4260_s26  ;;  %s4265_s13 = sshll.u32 %s4389_s10, 4  ;;  %s4266_s13 = int_to_ptr.vmem [resolvable:$false] %s4265_s13 }
  0x67   : > { %s4267_s20 = scalar_lea.vmem %s4266_s13, 512  ;;  %p4268_p4 = scmp.lt.s32.totalorder %s4592_s17, %s4266_s13 }
  0x68   : > { %p4263_p1 = pnand %p4261_p12, %p4247_p0  ;;  %p4269_p13 = scmp.lt.s32.totalorder %s4267_s20, %s4260_s26 }
  0x6a   : > { %p4264_p5 = pneg %p4263_p1  ;;  %p4270_p6 = por %p4269_p13, %p4268_p4 }
  0x6c   : > { %p4271_p10 = pnand %p4270_p6, %p4264_p5 }
  0x6e   : > { %4274 = shalt.err (!%p4271_p10)
}
  0x6f   : > { %s5217_s14 = smov 8   ;;  %s5218_s15 = smov 128  }
  0x70   : > { %4043 = dma.hbm_to_vmem [thread:$0]  (!%p4594_p11), %s4590_s16, 256, %s4592_s17, %s239_s19, %s5218_s15, %s5218_s15, %s5217_s14  }
  0x71   : > { %s3686_s7 = sshll.u32 %s4383_s24, 7  ;;  %s263_s20 = scalar_lea.vmem [#allocation5], %s3685_s30 }
  0x72   : > { %s4635_s13 = scalar_lea.hbm %s5191_s1, %s3686_s7  ;;  %s270_s0 = sshll.u32 %s263_s20, 4  ;;  %s271_s0 = int_to_ptr.vmem [resolvable:$true] %s270_s0 }
  0x73   : > { %s5219_s2 = sand.u32 1, %s4383_s24   ;;  %s4275_s11 = scalar_lea.hbm %s4635_s13, 128 }
  0x74   : > { %s260_s3 = scalar_lea.sflag [#allocation6], %s5219_s2  ;;  %p4276_p4 = scmp.ne.s32.totalorder %s4635_s13, %s4275_s11 }
  0x75   : > { %s4280_s17 = scalar_lea.hbm %s5191_s1, 256  ;;  %p4281_p3 = scmp.lt.u32.totalorder %s4635_s13, %s5191_s1 }
  0x76   : > { %p4278_p5 = pnand %p4276_p4, %p4247_p0  ;;  %p4282_p7 = scmp.lt.u32.totalorder %s4280_s17, %s4275_s11 }
  0x77   : > { %p4284_p12 = scmp.lt.u32.totalorder %s4275_s11, %s4635_s13 }
  0x78   : > { %p4279_p2 = pneg %p4278_p5  ;;  %p4283_p9 = por %p4282_p7, %p4281_p3 }
  0x7a   : > { %p4285_p1 = por %p4284_p12, %p4283_p9 }
  0x7c   : > { %p4286_p13 = pnand %p4285_p1, %p4279_p2 }
  0x7e   : > { %4289 = shalt.err (!%p4286_p13)
}
  0x7f   : > { %s4290_s2 = scalar_lea.vmem %s271_s0, 128  ;;  %s4390_s30 = smov [#allocation5]  }
  0x80   : > { %p4291_p6 = scmp.ne.s32.totalorder %s271_s0, %s4290_s2  ;;  %s4295_s15 = sshll.u32 %s4390_s30, 4  ;;  %s4296_s15 = int_to_ptr.vmem [resolvable:$false] %s4295_s15 }
  0x81   : > { %s4297_s7 = scalar_lea.vmem %s4296_s15, 256  ;;  %p4298_p5 = scmp.lt.s32.totalorder %s271_s0, %s4296_s15 }
  0x82   : > { %p4293_p10 = pnand %p4291_p6, %p4247_p0  ;;  %p4299_p8 = scmp.lt.s32.totalorder %s4297_s7, %s4290_s2 }
  0x84   : > { %p4294_p4 = pneg %p4293_p10  ;;  %p4300_p3 = por %p4299_p8, %p4298_p5 }
  0x86   : > { %p4301_p7 = pnand %p4300_p3, %p4294_p4 }
  0x88   : > { %4304 = shalt.err (!%p4301_p7)
}
  0x89   : > { %4046 = dma.hbm_to_vmem [thread:$0]  (!%p4594_p11), %s4635_s13, 128, %s271_s0, %s260_s3  }
  0x8a   : > { %p5220_p2 = scmp.ne.s32.totalorder %s5208_s29, 0 }
  0x8b   : > { %s4663_s11 = sand.u32 (!%p5220_p2), 1, %s4375_s22   ;;  %p5221_p8 = scmp.ne.s32.totalorder (!%p5220_p2), %s5206_s27, 0 }
  0x8c   : > { %279 = sbr.rel (%p5220_p2) target bundleno = 2220 (0x8ac), region = 44  ;;  %s3688_s10 = sshll.u32 (!%p5220_p2), %s4663_s11, 4 }
  0x8d   : > { %s282_s26 = scalar_lea.sflag (!%p5220_p2), [#allocation3], %s4663_s11  ;;  %s4669_s20 = scalar_lea.vmem (!%p5220_p2), [#allocation2], %s3688_s10 }
  0x93   : > { %4350 = dma.done.wait (%p5221_p8), %s282_s26, 256  }
  0x94   : > { %4352 = vsyncadd (%p5221_p8), %s282_s26, 4294967040  ;;  %s290_s0 = sand.u32 1, %s4469_s25   ;;  %s3689_s3 = sshll.u32 %s4663_s11, 3 }
  0x95   : > { %s291_s29 = scalar_lea.sflag [#allocation6], %s290_s0  ;;  %s4677_s18 = scalar_lea.vmem [#allocation5], %s3689_s3 }
  0x96   : > { %4354 = dma.done.wait (%p5221_p8), %s291_s29, 128  }
  0x97   : > { %4356 = vsyncadd (%p5221_p8), %s291_s29, 4294967168  ;;  %p5222_p11 = scmp.eq.s32.totalorder %s4469_s25, 0 }
  0x99   : > { %4358 = dma.done.wait (%p5222_p11), [#allocation6], 512   ;;  %p5223_p0 = pmov %p5222_p11 }
  0x9b   : > { %4360 = vsyncadd (%p5223_p0), [#allocation6], 4294966784  ;;  %p5224_p9 = pmov %p5223_p0 }
  0x9c   : > { %p5225_p12 = pmov %p5223_p0 }
  0x9d   : > { %4362 = dma.done.wait (%p5224_p9), [#allocation9], 512  }
  0x9e   : > { %4364 = vsyncadd (%p5225_p12), [#allocation9], 4294966784  ;;  %v4391_v0 = vmov 0.0|0.0   ;;  %vm4392_vm0 = vmmov 0   ;;  %v4393_v1 = vmov 0.0   ;;  %v340_v2 = vld [vmem:[#allocation8] sm:$0xff] }
  0x9f   : > { %3973 = vmatprep.subr.bf16.mxu1 %v4391_v0  ;;  %3855 = vmatprep.mubr.msk.f32.mxu1 %vm4392_vm0, %v4393_v1  ;;  %v341_v3 = vld [vmem:[#allocation8 + $0x8] sm:$0xff]  ;;  %v342_v4 = vld [vmem:[#allocation8 + $0x10] sm:$0xff]  ;;  %v343_v6 = vld [vmem:[#allocation8 + $0x18] sm:$0xff]  ;;  %vm355_vm1 = vcmask 261120   ;;  %s4394_s19 = smov 116   ;;  %s4395_s16 = smov 124  }
  0xa0   : > { %v3974_v5 = vpack.c.bf16 %v341_v3, %v340_v2  ;;  %v4694_v7 = vld [vmem:[#allocation7] sm:$0xff]  ;;  %v4696_v8 = vld [vmem:[#allocation7 + $0x8] sm:$0xff]  ;;  %v4698_v9 = vld [vmem:[#allocation7 + $0x10] sm:$0xff]  ;;  %v3977_v11 = vpack.c.bf16 %v343_v6, %v342_v4  ;;  %vm824_vm2 = vcmask 31744   ;;  %s4396_s14 = smov 112   ;;  %s4397_s2 = smov 120  }
  0xa1   : > { %v4700_v10 = vld [vmem:[#allocation7 + $0x18] sm:$0xff]  ;;  %v4114_v12 = vpack.i.bf16 %v4696_v8, %v4694_v7  ;;  %v3965_v13 = vpack.c.bf16 %v4696_v8, %v4694_v7  ;;  %v346_v15 = vld [vmem:[%s4669_s20] sm:$0xff]  ;;  %s4398_s30 = smov 104   ;;  %s4399_s15 = smov 108   ;;  %vm829_vm3 = vcmask 1043456   ;;  %vm1482_vm4 = vcmask 64512  }
  0xa2   : > { %3975 = vmatpush3.bf16.msra.mxu1 %v3974_v5  ;;  %v3969_v14 = vpack.c.bf16 %v4700_v10, %v4698_v9  ;;  %3844 = vmatprep.mubr.msk.f32.mxu0 %vm355_vm1, %v346_v15  ;;  %v348_v16 = vld [vmem:[%s4677_s18] sm:$0xff]  ;;  %v347_v17 = vld [vmem:[%s4669_s20 + $0x8] sm:$0xff]  ;;  %s4400_s7 = smov 100   ;;  %s4401_s26 = smov 96   ;;  %vm4934_vm5 = vmpackc.low %vm1482_vm4, %vm1482_vm4  ;;  %vm3431_vm6 = vcmask 97280   ;;  %vm3434_vm7 = vcmask 130048  }
  0xa3   : > { %3976 = vmatprep.subr.bf16.mxu1 %v4391_v0  ;;  %3966 = vmatprep.subr.bf16.mxu0 %v3965_v13  ;;  %v3696_v18 = vld [vmem:[%s5195_s5] ss:$0 sm:$0xff]  ;;  %s4404_s20 = smov 8   ;;  %s4405_s0 = smov 4   ;;  %vm3437_vm8 = vcmask 162816   ;;  %vm3440_vm9 = vcmask 195584  }
  0xa4   : > { %3968 = vmatpush3.bf16.msra.mxu0 %v3965_v13  ;;  %v3693_v24 = vld [vmem:[%s5194_s4] ss:$0 sm:$0xff]  ;;  %s4406_s3 = smov 12   ;;  %s4407_s29 = smov 16   ;;  %vm3443_vm10 = vcmask 228352  }
  0xa5   : > { %3970 = vmatprep.subr.bf16.mxu0 %v3969_v14  ;;  %s4408_s18 = smov 20   ;;  %s4409_s27 = smov 24  }
  0xa6   : > { %3978 = vmatpush3.bf16.msra.mxu1 %v3977_v11  ;;  %s4410_s13 = smov 28   ;;  %s335_s17 = scalar_lea.vmem [#allocation10], %s3688_s10 }
  0xa7   : > { %s3562_s12 = sshll.u32 %s335_s17, 4  ;;  %s3549_s10 = scalar_lea.sflag [#allocation4], %s4663_s11  ;;  %s5138_s12 = int_to_ptr.vmem [resolvable:$true] %s3562_s12 }
  0xa8   : > { %3972 = vmatpush3.bf16.msra.mxu0 %v3969_v14  ;;  %p5228_p13 = scmp.ne.s32.totalorder %s5213_s9, 0 }
  0xa9   : > { %3856 = vmatmul.mubr.msk.f32.vlgmr.msra.gmra.mrb[0].mxu1 %vm355_vm1, %v348_v16 }
  0xab   : > { %3845 = vmatmul.mubr.msk.f32.vlgmr.msra.gmra.mrb[0].mxu0 %vm355_vm1, %v347_v17 }
 0x17c   : > { %v512_v19 = vpop.f32.mrb[0].mxu1 }
 0x17d   : > { %v4718_v20 = vadd.f32 %v3696_v18, %v512_v19  ;;  %v3857_v21 = vpop.f32.mrb[1].mxu1 }
 0x17e   : > { %v3846_v22 = vpop.f32.mrb[0].mxu0 }
 0x17f   : > { %553 = vrot.lane.b32.xlu1 %v4718_v20, %s4394_s19  ;;  %547 = vrot.lane.b32.xlu0 %v4718_v20, %s4395_s16  ;;  %v428_v23 = vpop.f32.mrb[1].mxu0  ;;  %v434_v26 = vadd.f32 %v3846_v22, %v3693_v24 }
 0x180   : > { %v429_v25 = vadd.f32 %v3693_v24, %v428_v23 }
 0x182   : > { %3860 = vmatprep.mubr.msk.f32.mxu1 %vm824_vm2, %v429_v25 }
 0x183   : > { %556 = vrot.lane.b32.xlu1 %v4718_v20, %s4396_s14  ;;  %550 = vrot.lane.b32.xlu0 %v4718_v20, %s4397_s2 }
 0x187   : > { %562 = vrot.lane.b32.xlu1 %v4718_v20, %s4398_s30  ;;  %559 = vrot.lane.b32.xlu0 %v4718_v20, %s4399_s15 }
 0x18b   : > { %565 = vrot.lane.b32.xlu0 %v4718_v20, %s4400_s7 }
 0x18f   : > { %520 = vrot.lane.b32.xlu0 %v434_v26, %s4395_s16 }
 0x193   : > { %528 = vrot.lane.b32.xlu0 %v434_v26, %s4394_s19 }
 0x197   : > { %536 = vrot.lane.b32.xlu0 %v434_v26, %s4399_s15 }
 0x19b   : > { %526 = vrot.lane.b32.xlu0 %v429_v25, %s4394_s19 }
 0x19f   : > { %534 = vrot.lane.b32.xlu0 %v429_v25, %s4399_s15 }
 0x1a3   : > { %538 = vrot.lane.b32.xlu0 %v429_v25, %s4398_s30 }
 0x1b0   : > { %568 = vxpose.xlu1.b32.start.end [1/1] (short) (narrow) %v4718_v20, 8 }
 0x1ce   : > { %524 = vrot.lane.b32.xlu1 %v434_v26, %s4397_s2 }
 0x1d2   : > { %532 = vrot.lane.b32.xlu1 %v434_v26, %s4396_s14 }
 0x1d6   : > { %540 = vrot.lane.b32.xlu1 %v434_v26, %s4398_s30 }
 0x1da   : > { %518 = vrot.lane.b32.xlu1 %v429_v25, %s4395_s16 }
 0x1de   : > { %522 = vrot.lane.b32.xlu1 %v429_v25, %s4397_s2 }
 0x1e2   : > { %530 = vrot.lane.b32.xlu1 %v429_v25, %s4396_s14  ;;  %s3770_s14 = sshll.u32 %s4469_s25, 8  ;;  %s4305_s25 = scalar_lea.vmem %s5138_s12, 256 }
 0x1e3   : > { %s5143_s15 = scalar_lea.hbm %s5196_s6, %s3770_s14  ;;  %p4306_p1 = scmp.ne.s32.totalorder %s5138_s12, %s4305_s25 }
 0x1e5   : > { %p4307_p6 = pnand %p4306_p1, %p5228_p13 }
 0x1e6   : > { %542 = vrot.lane.b32.xlu1 %v429_v25, %s4400_s7 }
 0x1e7   : > { %p4308_p10 = pneg %p4307_p6 }
 0x1f1   : > { %v548_v27 = vpop.permute.xlu0 %547  ;;  %v554_v28 = vpop.permute.xlu1 %553 }
 0x1f2   : > { %600 = vxpose.xlu0.b32.start.end [1/1] (short) (narrow) %v548_v27, 8 }
 0x1f5   : > { %v4732_v29 = vpop.permute.xlu1 %556  ;;  %v551_v30 = vpop.permute.xlu0 %550 }
 0x1f9   : > { %v4734_v31 = vpop.permute.xlu1 %562  ;;  %v560_v33 = vpop.permute.xlu0 %559 }
 0x1fd   : > { %v4744_v35 = vpop.permute.xlu0 %565 }
 0x201   : > { %v521_v39 = vpop.permute.xlu0 %520 }
 0x205   : > { %v529_v41 = vpop.permute.xlu0 %528 }
 0x209   : > { %v537_v42 = vpop.permute.xlu0 %536 }
 0x20d   : > { %v527_v43 = vpop.permute.xlu0 %526 }
 0x20f   : > { %632 = vxpose.xlu1.b32.start.end [1/1] (short) (narrow) %v551_v30, 8 }
 0x211   : > { %v535_v44 = vpop.permute.xlu0 %534 }
 0x213   : > { %760 = vxpose.xlu1.b32.start.end [1/1] (short) (narrow) %v4734_v31, 8 }
 0x215   : > { %v539_v45 = vpop.permute.xlu0 %538 }
 0x21b   : > { %544 = vrot.lane.b32.xlu0 %v434_v26, %s4400_s7  ;;  %s4411_s7 = smov [#allocation10]  }
 0x230   : > { %v584_v32 = vpop.trf.xlu1 }
 0x231   : > { %3858 = vmatprep.subr.msk.mxu1 %vm829_vm3, %v584_v32  ;;  %1661 = vrot.lane.b32.xlu1 %v548_v27, %s4401_s26 }
 0x232   : > { %3859 = vmatpush3.msk.msra.mxu1 %vm829_vm3, %v584_v32 }
 0x233   : > { %3861 = vmatmul.mubr.msk.f32.vlgmr.msra.gmra.mrb[2].mxu1 %vm824_vm2, %v434_v26 }
 0x235   : > { %1665 = vrot.lane.b32.xlu1 %v554_v28, %s4401_s26 }
 0x239   : > { %664 = vxpose.xlu0.b32.start.end [1/1] (short) (narrow) %v554_v28, 8  ;;  %1669 = vrot.lane.b32.xlu1 %v560_v33, %s4401_s26 }
 0x23d   : > { %696 = vxpose.xlu0.b32.start.end [1/1] (short) (narrow) %v4732_v29, 8 }
 0x240   : > { %v525_v34 = vpop.permute.xlu1 %524 }
 0x241   : > { %728 = vxpose.xlu0.b32.start.end [1/1] (short) (narrow) %v560_v33, 8 }
 0x244   : > { %v533_v36 = vpop.permute.xlu1 %532 }
 0x245   : > { %792 = vxpose.xlu0.b32.start.end [1/1] (short) (narrow) %v4744_v35, 8 }
 0x248   : > { %v541_v37 = vpop.permute.xlu1 %540 }
 0x24c   : > { %v519_v38 = vpop.permute.xlu1 %518 }
 0x24d   : > { %3865 = vmatprep.mubr.msk.f32.mxu1 %vm824_vm2, %v519_v38 }
 0x250   : > { %v523_v40 = vpop.permute.xlu1 %522 }
 0x251   : > { %3870 = vmatprep.mubr.msk.f32.mxu0 %vm824_vm2, %v523_v40 }
 0x254   : > { %v531_v47 = vpop.permute.xlu1 %530 }
 0x258   : > { %v543_v48 = vpop.permute.xlu1 %542 }
 0x26e   : > { %1659 = vrot.lane.b32.xlu0 %v4718_v20, %s4401_s26 }
 0x272   : > { %1663 = vrot.lane.b32.xlu0 %v551_v30, %s4401_s26  ;;  %v616_v46 = vpop.trf.xlu0 }
 0x273   : > { %3863 = vmatprep.subr.msk.mxu1 %vm829_vm3, %v616_v46 }
 0x274   : > { %3864 = vmatpush3.msk.msra.mxu1 %vm829_vm3, %v616_v46 }
 0x275   : > { %3866 = vmatmul.mubr.msk.f32.vlgmr.msra.gmra.mrb[4].mxu1 %vm824_vm2, %v521_v39 }
 0x276   : > { %3875 = vmatprep.mubr.msk.f32.mxu1 %vm824_vm2, %v527_v43 }
 0x28d   : > { %v545_v50 = vpop.permute.xlu0 %544 }
 0x28f   : > { %v648_v49 = vpop.trf.xlu1 }
 0x290   : > { %3868 = vmatprep.subr.msk.mxu0 %vm829_vm3, %v648_v49 }
 0x291   : > { %3869 = vmatpush3.msk.msra.mxu0 %vm829_vm3, %v648_v49 }
 0x292   : > { %3871 = vmatmul.mubr.msk.f32.vlgmr.msra.gmra.mrb[2].mxu0 %vm824_vm2, %v525_v34 }
 0x293   : > { %3880 = vmatprep.mubr.msk.f32.mxu0 %vm824_vm2, %v531_v47  ;;  %v776_v53 = vpop.trf.xlu1 }
 0x2a3   : > { %v4805_v6 = vpop.permute.xlu1 %1661 }
 0x2a7   : > { %v4807_v11 = vpop.permute.xlu1 %1665 }
 0x2ab   : > { %v4817_v17 = vpop.permute.xlu1 %1669 }
 0x2b9   : > { %v680_v51 = vpop.trf.xlu0 }
 0x2ba   : > { %3873 = vmatprep.subr.msk.mxu1 %vm829_vm3, %v680_v51 }
 0x2bb   : > { %3874 = vmatpush3.msk.msra.mxu1 %vm829_vm3, %v680_v51 }
 0x2bc   : > { %3876 = vmatmul.mubr.msk.f32.vlgmr.msra.gmra.mrb[6].mxu1 %vm824_vm2, %v529_v41 }
 0x2bd   : > { %v712_v52 = vpop.trf.xlu0  ;;  %3885 = vmatprep.mubr.msk.f32.mxu1 %vm824_vm2, %v535_v44 }
 0x2be   : > { %3878 = vmatprep.subr.msk.mxu0 %vm829_vm3, %v712_v52 }
 0x2bf   : > { %3879 = vmatpush3.msk.msra.mxu0 %vm829_vm3, %v712_v52 }
 0x2c0   : > { %3881 = vmatmul.mubr.msk.f32.vlgmr.msra.gmra.mrb[4].mxu0 %vm824_vm2, %v533_v36  ;;  %3888 = vmatprep.subr.msk.mxu0 %vm829_vm3, %v776_v53 }
 0x2c1   : > { %v744_v54 = vpop.trf.xlu0  ;;  %3890 = vmatprep.mubr.msk.f32.mxu0 %vm824_vm2, %v539_v45  ;;  %3889 = vmatpush3.msk.msra.mxu0 %vm829_vm3, %v776_v53 }
 0x2c2   : > { %3883 = vmatprep.subr.msk.mxu1 %vm829_vm3, %v744_v54  ;;  %3979 = vmatprep.subr.bf16.mxu0 %v4391_v0 }
 0x2c3   : > { %3884 = vmatpush3.msk.msra.mxu1 %vm829_vm3, %v744_v54 }
 0x2c4   : > { %3886 = vmatmul.mubr.msk.f32.vlgmr.msra.gmra.mrb[8].mxu1 %vm824_vm2, %v537_v42  ;;  %3891 = vmatmul.mubr.msk.f32.vlgmr.msra.gmra.mrb[6].mxu0 %vm824_vm2, %v541_v37 }
 0x2c5   : > { %v808_v55 = vpop.trf.xlu0  ;;  %3895 = vmatprep.mubr.msk.f32.mxu1 %vm824_vm2, %v543_v48  ;;  %3902 = vmatprep.mubr.msk.f32.mxu0 %vm4392_vm0, %v4393_v1 }
 0x2c6   : > { %3893 = vmatprep.subr.msk.mxu1 %vm829_vm3, %v808_v55 }
 0x2c7   : > { %3894 = vmatpush3.msk.msra.mxu1 %vm829_vm3, %v808_v55 }
 0x2c8   : > { %3896 = vmatmul.mubr.msk.f32.vlgmr.msra.gmra.mrb[10].mxu1 %vm824_vm2, %v545_v50  ;;  %3983 = vmatprep.subr.bf16.mxu1 %v4391_v0 }
 0x2c9   : > { %3909 = vmatprep.mubr.msk.f32.mxu1 %vm4392_vm0, %v4393_v1 }
 0x2e0   : > { %v4857_v42 = vpop.permute.xlu0 %1659 }
 0x2e4   : > { %v4859_v43 = vpop.permute.xlu0 %1663 }
 0x306   : > { %v4784_v56 = vpop.f32.mrb[2].mxu1 }
 0x307   : > { %v899_v57 = vpop.f32.mrb[3].mxu1  ;;  %v1486_v58 = vsel %vm1482_vm4, %v4784_v56, -inf }
 0x308   : > { %1487 = vmax.xlane.f32.xlu0 %v1486_v58  ;;  %v1483_v59 = vsel %vm1482_vm4, %v899_v57, -inf }
 0x309   : > { %1484 = vmax.xlane.f32.xlu1 %v1483_v59 }
 0x348   : > { %v4789_v60 = vpop.f32.mrb[4].mxu1 }
 0x349   : > { %v4791_v61 = vpop.f32.mrb[5].mxu1  ;;  %v1492_v62 = vsel %vm1482_vm4, %v4789_v60, -inf }
 0x34a   : > { %1493 = vmax.xlane.f32.xlu1 %v1492_v62  ;;  %v1489_v5 = vsel %vm1482_vm4, %v4791_v61, -inf }
 0x365   : > { %v4795_v63 = vpop.f32.mrb[2].mxu0 }
 0x366   : > { %v4797_v2 = vpop.f32.mrb[3].mxu0  ;;  %v1498_v3 = vsel %vm1482_vm4, %v4795_v63, -inf }
 0x367   : > { %1499 = vmax.xlane.f32.xlu1 %v1498_v3  ;;  %v1495_v4 = vsel %vm1482_vm4, %v4797_v2, -inf }
 0x368   : > { %1496 = vmax.xlane.f32.xlu0 %v1495_v4 }
 0x36b   : > { %1490 = vmax.xlane.f32.xlu1 %v1489_v5 }
 0x38f   : > { %v4809_v13 = vpop.f32.mrb[6].mxu1 }
 0x390   : > { %v4811_v14 = vpop.f32.mrb[7].mxu1  ;;  %v1504_v15 = vsel %vm1482_vm4, %v4809_v13, -inf }
 0x391   : > { %1505 = vmax.xlane.f32.xlu1 %v1504_v15  ;;  %v1501_v16 = vsel %vm1482_vm4, %v4811_v14, -inf }
 0x392   : > { %1502 = vmax.xlane.f32.xlu0 %v1501_v16 }
 0x393   : > { %v4819_v18 = vpop.f32.mrb[4].mxu0 }
 0x394   : > { %v4821_v19 = vpop.f32.mrb[5].mxu0  ;;  %v1510_v20 = vsel %vm1482_vm4, %v4819_v18, -inf }
 0x395   : > { %1511 = vmax.xlane.f32.xlu1 %v1510_v20  ;;  %v1507_v21 = vsel %vm1482_vm4, %v4821_v19, -inf  ;;  %v1488_v44 = vpop.xlane.xlu0 %1487 }
 0x396   : > { %v1485_v22 = vpop.xlane.xlu1 %1484  ;;  %1508 = vmax.xlane.f32.xlu0 %v1507_v21  ;;  %v1532_v45 = vsub.f32 %v4784_v56, %v1488_v44 }
 0x397   : > { %v1531_v23 = vsub.f32 %v899_v57, %v1485_v22  ;;  %v4827_v24 = vpop.f32.mrb[8].mxu1  ;;  %v4829_v25 = vpop.f32.mrb[6].mxu0 }
 0x398   : > { %v4831_v26 = vpop.f32.mrb[9].mxu1  ;;  %v4833_v27 = vpop.f32.mrb[7].mxu0  ;;  %v1516_v28 = vsel %vm1482_vm4, %v4827_v24, -inf  ;;  %v1522_v36 = vsel %vm1482_vm4, %v4829_v25, -inf  ;;  %v1549_v46 = vmul.f32 1.442695, %v1532_v45 }
 0x399   : > { %v1547_v30 = vmul.f32 1.442695, %v1531_v23  ;;  %1517 = vmax.xlane.f32.xlu1 %v1516_v28  ;;  %v1513_v32 = vsel %vm1482_vm4, %v4831_v26, -inf  ;;  %v1519_v37 = vsel %vm1482_vm4, %v4833_v27, -inf }
 0x39a   : > { %1514 = vmax.xlane.f32.xlu0 %v1513_v32 }
 0x39b   : > { %4124 = vpow2.f32 %v1547_v30  ;;  %v4839_v33 = vpop.f32.mrb[10].mxu1 }
 0x39c   : > { %v4841_v34 = vpop.f32.mrb[11].mxu1  ;;  %v1528_v38 = vsel %vm1482_vm4, %v4839_v33, -inf  ;;  %4126 = vpow2.f32 %v1549_v46 }
 0x39d   : > { %1523 = vmax.xlane.f32.xlu1 %v1522_v36  ;;  %v1525_v39 = vsel %vm1482_vm4, %v4841_v34, -inf }
 0x39e   : > { %1520 = vmax.xlane.f32.xlu0 %v1519_v37 }
 0x3a1   : > { %1529 = vmax.xlane.f32.xlu1 %v1528_v38 }
 0x3a2   : > { %1526 = vmax.xlane.f32.xlu0 %v1525_v39 }
 0x3a5   : > { %v4851_v40 = vpop.eup %4124 }
 0x3a6   : > { %v1579_v41 = vsel %vm1482_vm4, %v4851_v40, 0.0  ;;  %v4862_v47 = vpop.eup %4126 }
 0x3a7   : > { %1580 = vadd.xlane.f32.xlu0 %v1579_v41  ;;  %v1582_v48 = vsel %vm1482_vm4, %v4862_v47, 0.0 }
 0x3b2   : > { %1673 = vrot.lane.b32.xlu1 %v4744_v35, %s4401_s26 }
 0x3d6   : > { %1583 = vadd.xlane.f32.xlu1 %v1582_v48 }
 0x3d7   : > { %v1494_v49 = vpop.xlane.xlu1 %1493 }
 0x3d8   : > { %v1534_v50 = vsub.f32 %v4789_v60, %v1494_v49 }
 0x3da   : > { %v1553_v51 = vmul.f32 1.442695, %v1534_v50 }
 0x3dc   : > { %4128 = vpow2.f32 %v1553_v51 }
 0x3e6   : > { %v4867_v35 = vpop.eup %4128 }
 0x3e7   : > { %v1588_v52 = vsel %vm1482_vm4, %v4867_v35, 0.0 }
 0x3e8   : > { %1589 = vadd.xlane.f32.xlu1 %v1588_v52 }
 0x3f4   : > { %v1500_v53 = vpop.xlane.xlu1 %1499 }
 0x3f5   : > { %v1536_v54 = vsub.f32 %v4795_v63, %v1500_v53  ;;  %v1497_v55 = vpop.xlane.xlu0 %1496 }
 0x3f6   : > { %v1535_v56 = vsub.f32 %v4797_v2, %v1497_v55 }
 0x3f7   : > { %v1557_v57 = vmul.f32 1.442695, %v1536_v54 }
 0x3f8   : > { %v1555_v58 = vmul.f32 1.442695, %v1535_v56  ;;  %v1491_v59 = vpop.xlane.xlu1 %1490 }
 0x3f9   : > { %4130 = vpow2.f32 %v1557_v57  ;;  %v1533_v60 = vsub.f32 %v4791_v61, %v1491_v59 }
 0x3fa   : > { %4132 = vpow2.f32 %v1555_v58 }
 0x3fb   : > { %v1551_v62 = vmul.f32 1.442695, %v1533_v60 }
 0x3fd   : > { %4134 = vpow2.f32 %v1551_v62 }
 0x403   : > { %v4874_v3 = vpop.eup %4130 }
 0x404   : > { %v4876_v4 = vpop.eup %4132  ;;  %v1594_v5 = vsel %vm1482_vm4, %v4874_v3, 0.0 }
 0x405   : > { %1595 = vadd.xlane.f32.xlu0 %v1594_v5  ;;  %v1591_v63 = vsel %vm1482_vm4, %v4876_v4, 0.0 }
 0x406   : > { %1592 = vadd.xlane.f32.xlu1 %v1591_v63 }
 0x407   : > { %v4882_v2 = vpop.eup %4134 }
 0x408   : > { %v1585_v61 = vsel %vm1482_vm4, %v4882_v2, 0.0 }
 0x409   : > { %1586 = vadd.xlane.f32.xlu0 %v1585_v61 }
 0x41e   : > { %v1506_v15 = vpop.xlane.xlu1 %1505 }
 0x41f   : > { %v1538_v16 = vsub.f32 %v4809_v13, %v1506_v15  ;;  %v1503_v20 = vpop.xlane.xlu0 %1502 }
 0x420   : > { %v1537_v21 = vsub.f32 %v4811_v14, %v1503_v20 }
 0x421   : > { %v1561_v22 = vmul.f32 1.442695, %v1538_v16 }
 0x422   : > { %v1559_v23 = vmul.f32 1.442695, %v1537_v21  ;;  %v1512_v28 = vpop.xlane.xlu1 %1511 }
 0x423   : > { %4136 = vpow2.f32 %v1561_v22  ;;  %v1540_v30 = vsub.f32 %v4819_v18, %v1512_v28  ;;  %v1509_v32 = vpop.xlane.xlu0 %1508 }
 0x424   : > { %4138 = vpow2.f32 %v1559_v23  ;;  %v1539_v36 = vsub.f32 %v4821_v19, %v1509_v32 }
 0x426   : > { %v1563_v37 = vmul.f32 1.442695, %v1539_v36  ;;  %v1518_v38 = vpop.xlane.xlu1 %1517 }
 0x427   : > { %v1542_v39 = vsub.f32 %v4827_v24, %v1518_v38  ;;  %v1515_v41 = vpop.xlane.xlu0 %1514 }
 0x428   : > { %4140 = vpow2.f32 %v1563_v37  ;;  %v1541_v13 = vsub.f32 %v4831_v26, %v1515_v41 }
 0x429   : > { %v1569_v44 = vmul.f32 1.442695, %v1542_v39 }
 0x42a   : > { %v4892_v14 = vpop.xlane.xlu1 %1523  ;;  %v1567_v22 = vmul.f32 1.442695, %v1541_v13 }
 0x42b   : > { %4142 = vpow2.f32 %v1569_v44  ;;  %v1544_v45 = vsub.f32 %v4829_v25, %v4892_v14  ;;  %v1521_v18 = vpop.xlane.xlu0 %1520 }
 0x42c   : > { %v1543_v46 = vsub.f32 %v4833_v27, %v1521_v18 }
 0x42d   : > { %v4897_v48 = vpop.eup %4136  ;;  %v1573_v13 = vmul.f32 1.442695, %v1544_v45 }
 0x42e   : > { %v4899_v19 = vpop.eup %4138  ;;  %v1571_v49 = vmul.f32 1.442695, %v1543_v46  ;;  %v1530_v24 = vpop.xlane.xlu1 %1529  ;;  %v1600_v50 = vsel %vm1482_vm4, %v4897_v48, 0.0 }
 0x42f   : > { %v1546_v26 = vsub.f32 %v4839_v33, %v1530_v24  ;;  %1601 = vadd.xlane.f32.xlu1 %v1600_v50  ;;  %v4904_v51 = vpop.xlane.xlu0 %1526  ;;  %v1597_v52 = vsel %vm1482_vm4, %v4899_v19, 0.0 }
 0x430   : > { %4144 = vpow2.f32 %v1571_v49  ;;  %v1545_v27 = vsub.f32 %v4841_v34, %v4904_v51  ;;  %1598 = vadd.xlane.f32.xlu0 %v1597_v52 }
 0x431   : > { %v1577_v53 = vmul.f32 1.442695, %v1546_v26 }
 0x432   : > { %v4910_v54 = vpop.eup %4140  ;;  %v4927_v62 = vpop.permute.xlu1 %1673 }
 0x433   : > { %4146 = vpow2.f32 %v1577_v53  ;;  %v1603_v55 = vsel %vm1482_vm4, %v4910_v54, 0.0 }
 0x434   : > { %1604 = vadd.xlane.f32.xlu1 %v1603_v55  ;;  %v1581_v5 = vpop.xlane.xlu0 %1580 }
 0x435   : > { %v4914_v33 = vpop.eup %4142  ;;  %4148 = vrcp.f32 %v1581_v5 }
 0x436   : > { %v1612_v56 = vsel %vm1482_vm4, %v4914_v33, 0.0 }
 0x438   : > { %1613 = vadd.xlane.f32.xlu1 %v1612_v56 }
 0x43a   : > { %v4918_v57 = vpop.eup %4144 }
 0x43b   : > { %v1615_v58 = vsel %vm1482_vm4, %v4918_v57, 0.0 }
 0x43c   : > { %1616 = vadd.xlane.f32.xlu1 %v1615_v58 }
 0x43d   : > { %v4922_v59 = vpop.eup %4146 }
 0x43e   : > { %v1624_v60 = vsel %vm1482_vm4, %v4922_v59, 0.0 }
 0x43f   : > { %v4149_v61 = vpop.eup %4148 }
 0x440   : > { %1625 = vadd.xlane.f32.xlu1 %v1624_v60  ;;  %v1643_v16 = vmul.f32 %v4149_v61, %v4851_v40 }
 0x45d   : > { %1715 = vxpose.xlu0.b32.start.end [1/1] (short) (narrow) %v4805_v6, 8 }
 0x461   : > { %1747 = vxpose.xlu0.b32.start.end [1/1] (short) (narrow) %v4859_v43, 8  ;;  %v1565_v43 = vmul.f32 1.442695, %v1540_v30 }
 0x463   : > { %v1584_v63 = vpop.xlane.xlu1 %1583 }
 0x464   : > { %4150 = vrcp.f32 %v1584_v63 }
 0x465   : > { %4152 = vpow2.f32 %v1565_v43 }
 0x466   : > { %4154 = vpow2.f32 %v1567_v22 }
 0x46e   : > { %v4151_v15 = vpop.eup %4150 }
 0x46f   : > { %v1644_v20 = vmul.f32 %v4151_v15, %v4862_v47  ;;  %v4942_v40 = vpop.eup %4152 }
 0x470   : > { %v1606_v47 = vsel %vm1482_vm4, %v4942_v40, 0.0  ;;  %v4946_v23 = vpop.eup %4154 }
 0x471   : > { %v3980_v6 = vpack.c.bf16 %v1644_v20, %v1643_v16 }
 0x473   : > { %1683 = vxpose.xlu1.b32.start.end [1/1] (short) (narrow) %v4857_v42, 8  ;;  %3982 = vmatpush3.bf16.xpose.msk.msra.mxu0 %vm4934_vm5, %v3980_v6  ;;  %v1609_v42 = vsel %vm1482_vm4, %v4946_v23, 0.0 }
 0x474   : > { %3987 = vmatprep.subr.bf16.mxu0 %v4391_v0 }
 0x475   : > { %v1590_v28 = vpop.xlane.xlu1 %1589 }
 0x476   : > { %4156 = vrcp.f32 %v1590_v28 }
 0x480   : > { %v4157_v30 = vpop.eup %4156 }
 0x481   : > { %v1646_v38 = vmul.f32 %v4157_v30, %v4867_v35 }
 0x48e   : > { %1607 = vadd.xlane.f32.xlu0 %v1606_v47 }
 0x492   : > { %1610 = vadd.xlane.f32.xlu0 %v1609_v42  ;;  %v1596_v32 = vpop.xlane.xlu0 %1595 }
 0x493   : > { %v1593_v18 = vpop.xlane.xlu1 %1592 }
 0x496   : > { %v1587_v36 = vpop.xlane.xlu0 %1586 }
 0x497   : > { %4158 = vrcp.f32 %v1587_v36 }
 0x498   : > { %4160 = vpow2.f32 %v1573_v13 }
 0x4a1   : > { %v4159_v37 = vpop.eup %4158 }
 0x4a2   : > { %v1645_v39 = vmul.f32 %v4159_v37, %v4882_v2  ;;  %v4960_v44 = vpop.eup %4160 }
 0x4a3   : > { %v1618_v35 = vsel %vm1482_vm4, %v4960_v44, 0.0 }
 0x4a4   : > { %v3984_v41 = vpack.c.bf16 %v1646_v38, %v1645_v39 }
 0x4a6   : > { %3986 = vmatpush3.bf16.xpose.msk.msra.mxu1 %vm4934_vm5, %v3984_v41 }
 0x4a7   : > { %3991 = vmatprep.subr.bf16.mxu1 %v4391_v0 }
 0x4a8   : > { %1667 = vrot.lane.b32.xlu0 %v4732_v29, %s4401_s26 }
 0x4bc   : > { %v1602_v2 = vpop.xlane.xlu1 %1601 }
 0x4bd   : > { %v1599_v46 = vpop.xlane.xlu0 %1598  ;;  %4162 = vrcp.f32 %v1602_v2 }
 0x4be   : > { %4164 = vrcp.f32 %v1599_v46 }
 0x4bf   : > { %4166 = vrcp.f32 %v1596_v32 }
 0x4c0   : > { %4168 = vrcp.f32 %v1593_v18 }
 0x4c1   : > { %v1605_v25 = vpop.xlane.xlu1 %1604 }
 0x4c7   : > { %1619 = vadd.xlane.f32.xlu0 %v1618_v35  ;;  %v4163_v49 = vpop.eup %4162 }
 0x4c8   : > { %v4165_v24 = vpop.eup %4164  ;;  %v1650_v29 = vmul.f32 %v4163_v49, %v4897_v48  ;;  %v1614_v48 = vpop.xlane.xlu1 %1613 }
 0x4c9   : > { %v1649_v50 = vmul.f32 %v4165_v24, %v4899_v19  ;;  %v4167_v26 = vpop.eup %4166 }
 0x4ca   : > { %v4169_v52 = vpop.eup %4168  ;;  %v1648_v53 = vmul.f32 %v4167_v26, %v4874_v3 }
 0x4cb   : > { %v3992_v45 = vpack.c.bf16 %v1650_v29, %v1649_v50  ;;  %v1647_v55 = vmul.f32 %v4169_v52, %v4876_v4 }
 0x4cc   : > { %v1617_v19 = vpop.xlane.xlu1 %1616 }
 0x4cd   : > { %v3988_v60 = vpack.c.bf16 %v1648_v53, %v1647_v55 }
 0x4d0   : > { %v1626_v56 = vpop.xlane.xlu1 %1625 }
 0x4dd   : > { %1671 = vrot.lane.b32.xlu0 %v4734_v31, %s4401_s26  ;;  %v1731_v14 = vpop.trf.xlu0  ;;  %v1575_v31 = vmul.f32 1.442695, %v1545_v27 }
 0x4de   : > { %3910 = vmatmul.mubr.msk.f32.vlgmr.msra.gmra.mrb[12].mxu1 %vm1482_vm4, %v1731_v14 }
 0x4df   : > { %3994 = vmatpush3.bf16.xpose.msk.msra.mxu1 %vm4934_vm5, %v3992_v45  ;;  %3923 = vmatprep.mubr.msk.f32.mxu1 %vm4392_vm0, %v4393_v1  ;;  %4170 = vpow2.f32 %v1575_v31 }
 0x4e0   : > { %3999 = vmatprep.subr.bf16.mxu1 %v4391_v0  ;;  %4172 = vrcp.f32 %v1605_v25 }
 0x4e1   : > { %v1763_v27 = vpop.trf.xlu0 }
 0x4e9   : > { %v4171_v34 = vpop.eup %4170 }
 0x4ea   : > { %v1621_v51 = vsel %vm1482_vm4, %v4171_v34, 0.0  ;;  %v4173_v63 = vpop.eup %4172 }
 0x4eb   : > { %v1651_v15 = vmul.f32 %v4173_v63, %v4910_v54 }
 0x4f3   : > { %v1699_v58 = vpop.trf.xlu1 }
 0x4f4   : > { %3903 = vmatmul.mubr.msk.f32.vlgmr.msra.gmra.mrb[8].mxu0 %vm1482_vm4, %v1699_v58  ;;  %v4402_v58 = vmov 1983009808  }
 0x4f5   : > { %3990 = vmatpush3.bf16.xpose.msk.msra.mxu0 %vm4934_vm5, %v3988_v60  ;;  %3916 = vmatprep.mubr.msk.f32.mxu0 %vm4392_vm0, %v4393_v1  ;;  %v2830_v60 = vunpack.c.l.s4 %v4402_v58 }
 0x4f6   : > { %3995 = vmatprep.subr.bf16.mxu0 %v4391_v0 }
 0x4fc   : > { %1622 = vadd.xlane.f32.xlu0 %v1621_v51  ;;  %3917 = vmatmul.mubr.msk.f32.vlgmr.msra.gmra.mrb[10].mxu0 %vm1482_vm4, %v1763_v27  ;;  %v2831_v51 = vunpack.c.0.s8 %v2830_v60 }
 0x4fd   : > { %3930 = vmatprep.mubr.msk.f32.mxu0 %vm4392_vm0, %v4393_v1 }
 0x51b   : > { %v1608_v3 = vpop.xlane.xlu0 %1607 }
 0x51c   : > { %4174 = vrcp.f32 %v1608_v3 }
 0x51d   : > { %4176 = vrcp.f32 %v1614_v48 }
 0x51f   : > { %v1611_v4 = vpop.xlane.xlu0 %1610 }
 0x520   : > { %4178 = vrcp.f32 %v1611_v4 }
 0x521   : > { %4180 = vrcp.f32 %v1617_v19 }
 0x523   : > { %v1668_v5 = vpop.permute.xlu0 %1667 }
 0x524   : > { %1811 = vxpose.xlu1.b32.start.end [1/1] (short) (narrow) %v1668_v5, 8  ;;  %v4403_v5 = vmov 1934713408  }
 0x525   : > { %v2894_v63 = vunpack.c.l.s4 %v4403_v5 }
 0x526   : > { %v4175_v61 = vpop.eup %4174 }
 0x527   : > { %v1652_v16 = vmul.f32 %v4175_v61, %v4942_v40  ;;  %v4177_v20 = vpop.eup %4176 }
 0x528   : > { %v1654_v22 = vmul.f32 %v4177_v20, %v4914_v33  ;;  %v2895_v20 = vunpack.c.0.s8 %v2894_v63 }
 0x529   : > { %1779 = vxpose.xlu0.b32.start.end [1/1] (short) (narrow) %v4807_v11, 8  ;;  %v3996_v6 = vpack.c.bf16 %v1652_v16, %v1651_v15 }
 0x52a   : > { %v4179_v43 = vpop.eup %4178 }
 0x52b   : > { %v1653_v47 = vmul.f32 %v4179_v43, %v4946_v23  ;;  %3998 = vmatpush3.bf16.xpose.msk.msra.mxu0 %vm4934_vm5, %v3996_v6  ;;  %v4181_v40 = vpop.eup %4180 }
 0x52c   : > { %4003 = vmatprep.subr.bf16.mxu0 %v4391_v0  ;;  %v1655_v33 = vmul.f32 %v4181_v40, %v4918_v57 }
 0x52d   : > { %1843 = vxpose.xlu0.b32.start.end [1/1] (short) (narrow) %v4817_v17, 8  ;;  %v4000_v42 = vpack.c.bf16 %v1654_v22, %v1653_v47  ;;  %v4119_v17 = vpack.i.bf16 %v4700_v10, %v4698_v9 }
 0x531   : > { %1907 = vxpose.xlu0.b32.start.end [1/1] (short) (narrow) %v4927_v62, 8 }
 0x554   : > { %v1620_v54 = vpop.xlane.xlu0 %1619 }
 0x555   : > { %4182 = vrcp.f32 %v1620_v54 }
 0x558   : > { %v1672_v11 = vpop.permute.xlu0 %1671 }
 0x559   : > { %1875 = vxpose.xlu1.b32.start.end [1/1] (short) (narrow) %v1672_v11, 8 }
 0x55f   : > { %v4183_v28 = vpop.eup %4182 }
 0x560   : > { %v1656_v23 = vmul.f32 %v4183_v28, %v4960_v44 }
 0x562   : > { %v4004_v32 = vpack.c.bf16 %v1656_v23, %v1655_v33 }
 0x577   : > { %4115 = vrot.lane.b32.xlu1 %v4114_v12, %s4401_s26 }
 0x57b   : > { %4120 = vrot.lane.b32.xlu1 %v4119_v17, %s4401_s26 }
 0x589   : > { %v1623_v62 = vpop.xlane.xlu0 %1622 }
 0x58a   : > { %4184 = vrcp.f32 %v1623_v62 }
 0x58b   : > { %4186 = vrcp.f32 %v1626_v56 }
 0x594   : > { %v4185_v7 = vpop.eup %4184 }
 0x595   : > { %v4187_v8 = vpop.eup %4186  ;;  %v1657_v9 = vmul.f32 %v4185_v7, %v4171_v34  ;;  %v2832_v34 = vlaneseq }
 0x596   : > { %v1658_v10 = vmul.f32 %v4187_v8, %v4922_v59 }
 0x597   : > { %v2833_v27 = vshrl.u32 %v2832_v34, 7 }
 0x598   : > { %v4008_v30 = vpack.c.bf16 %v1658_v10, %v1657_v9 }
 0x599   : > { %v5027_v61 = vsub.s32 %v2831_v51, %v2833_v27  ;;  %v5031_v28 = vsub.s32 %v2895_v20, %v2833_v27 }
 0x5a4   : > { %v1827_v36 = vpop.trf.xlu1 }
 0x5a5   : > { %3931 = vmatmul.mubr.msk.f32.vlgmr.msra.gmra.mrb[12].mxu0 %vm1482_vm4, %v1827_v36 }
 0x5a6   : > { %4006 = vmatpush3.bf16.xpose.msk.msra.mxu0 %vm4934_vm5, %v4004_v32  ;;  %3944 = vmatprep.mubr.msk.f32.mxu0 %vm4392_vm0, %v4393_v1 }
 0x5a9   : > { %v1795_v57 = vpop.trf.xlu0 }
 0x5aa   : > { %3924 = vmatmul.mubr.msk.f32.vlgmr.msra.gmra.mrb[14].mxu1 %vm1482_vm4, %v1795_v57 }
 0x5ab   : > { %4002 = vmatpush3.bf16.xpose.msk.msra.mxu1 %vm4934_vm5, %v4000_v42  ;;  %3937 = vmatprep.mubr.msk.f32.mxu1 %vm4392_vm0, %v4393_v1 }
 0x5ac   : > { %4007 = vmatprep.subr.bf16.mxu1 %v4391_v0 }
 0x5ad   : > { %v1859_v12 = vpop.trf.xlu0 }
 0x5b1   : > { %v2093_v37 = vpop.f32.mrb[12].mxu1  ;;  %v1923_v39 = vpop.trf.xlu0 }
 0x5b2   : > { %3938 = vmatmul.mubr.msk.f32.vlgmr.msra.gmra.mrb[16].mxu1 %vm1482_vm4, %v1859_v12  ;;  %v3911_v38 = vpop.f32.mrb[13].mxu1  ;;  %2603 = vxpose.xlu0.b32.start.end [1/1] (short) (narrow) %v2093_v37, 16 }
 0x5b3   : > { %4010 = vmatpush3.bf16.xpose.msk.msra.mxu1 %vm4934_vm5, %v4008_v30  ;;  %3951 = vmatprep.mubr.msk.f32.mxu1 %vm4392_vm0, %v4393_v1 }
 0x5ba   : > { %3952 = vmatmul.mubr.msk.f32.vlgmr.msra.gmra.mrb[18].mxu1 %vm1482_vm4, %v1923_v39 }
 0x5c7   : > { %v2014_v0 = vpop.f32.mrb[8].mxu0 }
 0x5c8   : > { %2571 = vxpose.xlu1.b32.start.end [1/1] (short) (narrow) %v2014_v0, 16  ;;  %v3904_v41 = vpop.f32.mrb[9].mxu0 }
 0x5cf   : > { %v2172_v59 = vpop.f32.mrb[10].mxu0 }
 0x5d0   : > { %v3918_v13 = vpop.f32.mrb[11].mxu0  ;;  %2635 = vxpose.xlu1.b32.start.end [1/1] (short) (narrow) %v2172_v59, 16 }
 0x5d9   : > { %v1891_v44 = vpop.trf.xlu1 }
 0x5da   : > { %3945 = vmatmul.mubr.msk.f32.vlgmr.msra.gmra.mrb[14].mxu0 %vm1482_vm4, %v1891_v44 }
 0x5e9   : > { %v4116_v18 = vpop.permute.xlu1 %4115 }
 0x5ea   : > { %v4118_v35 = vunpack.i.h.bf16 %v4116_v18  ;;  %v4117_v2 = vunpack.i.l.bf16 %v4116_v18 }
 0x5ec   : > { %v4011_v21 = vpack.c.bf16 %v4118_v35, %v4117_v2 }
 0x5ed   : > { %v4121_v46 = vpop.permute.xlu1 %4120 }
 0x5ee   : > { %v4123_v49 = vunpack.i.h.bf16 %v4121_v46  ;;  %v4122_v24 = vunpack.i.l.bf16 %v4121_v46  ;;  %4012 = vmatprep.subr.bf16.mxu0 %v4011_v21 }
 0x5ef   : > { %4014 = vmatpush3.bf16.msra.mxu0 %v4011_v21 }
 0x5f0   : > { %v4015_v1 = vpack.c.bf16 %v4123_v49, %v4122_v24 }
 0x5f2   : > { %4016 = vmatprep.subr.bf16.mxu0 %v4015_v1 }
 0x5f3   : > { %4018 = vmatpush3.bf16.msra.mxu0 %v4015_v1 }
 0x632   : > { %v2619_v56 = vpop.trf.xlu0 }
 0x636   : > { %v2620_v4 = vpop.trf.xlu0 }
 0x648   : > { %v2587_v53 = vpop.trf.xlu1 }
 0x64c   : > { %v2588_v55 = vpop.trf.xlu1 }
 0x650   : > { %v2651_v3 = vpop.trf.xlu1 }
 0x651   : > { %v2827_v15 = vcombine.low %v2587_v53, %v2651_v3  ;;  %v2828_v16 = vcombine.high %v2587_v53, %v2651_v3 }
 0x653   : > { %v2835_v22 = vrot.slane %v2827_v15, %v5027_v61  ;;  %v2842_v47 = vrot.slane %v2828_v16, %v5027_v61 }
 0x654   : > { %v2652_v6 = vpop.trf.xlu1 }
 0x655   : > { %v2963_v11 = vcombine.low %v2588_v55, %v2652_v6  ;;  %v2964_v40 = vcombine.high %v2588_v55, %v2652_v6 }
 0x657   : > { %v2971_v7 = vrot.slane %v2963_v11, %v5027_v61  ;;  %v2978_v8 = vrot.slane %v2964_v40, %v5027_v61 }
 0x678   : > { %v2330_v29 = vpop.f32.mrb[12].mxu0 }
 0x679   : > { %2699 = vxpose.xlu1.b32.start.end [1/1] (short) (narrow) %v2330_v29, 16  ;;  %v3932_v50 = vpop.f32.mrb[13].mxu0 }
 0x67d   : > { %v2251_v25 = vpop.f32.mrb[14].mxu1 }
 0x67e   : > { %2667 = vxpose.xlu0.b32.start.end [1/1] (short) (narrow) %v2251_v25, 16  ;;  %v3925_v14 = vpop.f32.mrb[15].mxu1 }
 0x685   : > { %v2409_v45 = vpop.f32.mrb[16].mxu1 }
 0x686   : > { %2731 = vxpose.xlu0.b32.start.end [1/1] (short) (narrow) %v2409_v45, 16  ;;  %v3939_v48 = vpop.f32.mrb[17].mxu1 }
 0x68d   : > { %v2567_v19 = vpop.f32.mrb[18].mxu1 }
 0x68e   : > { %2795 = vxpose.xlu0.b32.start.end [1/1] (short) (narrow) %v2567_v19, 16  ;;  %v3953_v31 = vpop.f32.mrb[19].mxu1 }
 0x6ad   : > { %v2488_v26 = vpop.f32.mrb[14].mxu0 }
 0x6ae   : > { %2763 = vxpose.xlu1.b32.start.end [1/1] (short) (narrow) %v2488_v26, 16  ;;  %v3946_v52 = vpop.f32.mrb[15].mxu0 }
 0x6fe   : > { %v2683_v43 = vpop.trf.xlu0 }
 0x6ff   : > { %v2843_v42 = vcombine.low %v2619_v56, %v2683_v43  ;;  %v2844_v54 = vcombine.high %v2619_v56, %v2683_v43 }
 0x701   : > { %v2851_v33 = vrot.slane %v2843_v42, %v5027_v61  ;;  %v2858_v23 = vrot.slane %v2844_v54, %v5027_v61 }
 0x702   : > { %v2684_v32 = vpop.trf.xlu0 }
 0x703   : > { %v2891_v17 = vcombine.low %v2835_v22, %v2851_v33  ;;  %v2892_v62 = vcombine.high %v2835_v22, %v2851_v33  ;;  %v2907_v36 = vcombine.low %v2842_v47, %v2858_v23  ;;  %v2908_v57 = vcombine.high %v2842_v47, %v2858_v23 }
 0x704   : > { %v2979_v9 = vcombine.low %v2620_v4, %v2684_v32  ;;  %v2980_v10 = vcombine.high %v2620_v4, %v2684_v32 }
 0x705   : > { %v2899_v12 = vrot.slane %v2891_v17, %v5031_v28  ;;  %v2906_v30 = vrot.slane %v2892_v62, %v5031_v28  ;;  %v2915_v37 = vrot.slane %v2907_v36, %v5031_v28  ;;  %v2922_v38 = vrot.slane %v2908_v57, %v5031_v28  ;;  %v2715_v62 = vpop.trf.xlu1 }
 0x706   : > { %v2987_v39 = vrot.slane %v2979_v9, %v5027_v61  ;;  %v2994_v0 = vrot.slane %v2980_v10, %v5027_v61  ;;  %v2747_v17 = vpop.trf.xlu0 }
 0x707   : > { %v3746_v41 = vcombine.low %v2899_v12, %v2906_v30  ;;  %v3748_v59 = vcombine.high %v2899_v12, %v2906_v30  ;;  %v3750_v13 = vcombine.low %v2915_v37, %v2922_v38  ;;  %v3752_v44 = vcombine.high %v2915_v37, %v2922_v38 }
 0x708   : > { %v3027_v18 = vcombine.low %v2971_v7, %v2987_v39  ;;  %v3028_v35 = vcombine.high %v2971_v7, %v2987_v39  ;;  %v3043_v2 = vcombine.low %v2978_v8, %v2994_v0  ;;  %v3044_v21 = vcombine.high %v2978_v8, %v2994_v0 }
 0x709   : > { %v3107_v46 = vrot.slane %v3746_v41, %v5027_v61  ;;  %v3123_v49 = vrot.slane %v3748_v59, %v5027_v61  ;;  %v3139_v24 = vrot.slane %v3750_v13, %v5027_v61  ;;  %v3155_v1 = vrot.slane %v3752_v44, %v5027_v61  ;;  %v2716_v57 = vpop.trf.xlu1 }
 0x70a   : > { %v3035_v29 = vrot.slane %v3027_v18, %v5031_v28  ;;  %v3042_v50 = vrot.slane %v3028_v35, %v5031_v28  ;;  %v3051_v25 = vrot.slane %v3043_v2, %v5031_v28  ;;  %v3058_v14 = vrot.slane %v3044_v21, %v5031_v28  ;;  %v2748_v36 = vpop.trf.xlu0 }
 0x70b   : > { %v3164_v45 = vcombine.high %v3107_v46, %v3123_v49  ;;  %v3196_v48 = vcombine.high %v3139_v24, %v3155_v1  ;;  %v3163_v19 = vcombine.low %v3107_v46, %v3123_v49  ;;  %v3195_v31 = vcombine.low %v3139_v24, %v3155_v1 }
 0x70c   : > { %v3754_v26 = vcombine.low %v3035_v29, %v3042_v50  ;;  %v3756_v52 = vcombine.high %v3035_v29, %v3042_v50  ;;  %v3758_v53 = vcombine.low %v3051_v25, %v3058_v14  ;;  %v3760_v55 = vcombine.high %v3051_v25, %v3058_v14 }
 0x70d   : > { %v3178_v56 = vrot.slane %v3164_v45, %v5031_v28  ;;  %v3210_v58 = vrot.slane %v3196_v48, %v5031_v28  ;;  %v5054_v60 = vrot.slane %v3163_v19, %v5031_v28  ;;  %v5057_v34 = vrot.slane %v3195_v31, %v5031_v28 }
 0x70e   : > { %v3243_v51 = vrot.slane %v3754_v26, %v5027_v61  ;;  %v3259_v27 = vrot.slane %v3756_v52, %v5027_v61  ;;  %v3275_v3 = vrot.slane %v3758_v53, %v5027_v61  ;;  %v3291_v4 = vrot.slane %v3760_v55, %v5027_v61  ;;  %v2811_v7 = vpop.trf.xlu0 }
 0x70f   : > { %v3229_v5 = vcombine.low %v3178_v56, %v3210_v58  ;;  %v3228_v63 = vcombine.high %v5054_v60, %v5057_v34  ;;  %v3230_v43 = vcombine.high %v3178_v56, %v3210_v58  ;;  %v3227_v22 = vcombine.low %v5054_v60, %v5057_v34 }
 0x710   : > { %v3299_v15 = vcombine.low %v3243_v51, %v3259_v27  ;;  %v3331_v16 = vcombine.low %v3275_v3, %v3291_v4  ;;  %v3300_v20 = vcombine.high %v3243_v51, %v3259_v27  ;;  %v3332_v6 = vcombine.high %v3275_v3, %v3291_v4 }
 0x711   : > { %3381 = vrot.lane.b32.xlu1 %v3229_v5, %s4404_s20  ;;  %3373 = vrot.lane.b32.xlu0 %v3228_v63, %s4405_s0  ;;  %v2875_v8 = vcombine.low %v2747_v17, %v2811_v7  ;;  %v2876_v9 = vcombine.high %v2747_v17, %v2811_v7 }
 0x712   : > { %v5069_v47 = vrot.slane %v3299_v15, %v5031_v28  ;;  %v5072_v42 = vrot.slane %v3331_v16, %v5031_v28  ;;  %v3314_v54 = vrot.slane %v3300_v20, %v5031_v28  ;;  %v3346_v11 = vrot.slane %v3332_v6, %v5031_v28  ;;  %v2812_v12 = vpop.trf.xlu0 }
 0x713   : > { %v2883_v38 = vrot.slane %v2875_v8, %v5027_v61  ;;  %v2890_v39 = vrot.slane %v2876_v9, %v5027_v61  ;;  %v3011_v59 = vcombine.low %v2748_v36, %v2812_v12  ;;  %v3012_v13 = vcombine.high %v2748_v36, %v2812_v12 }
 0x714   : > { %v3364_v40 = vcombine.high %v5069_v47, %v5072_v42  ;;  %v3363_v33 = vcombine.low %v5069_v47, %v5072_v42  ;;  %v3366_v23 = vcombine.high %v3314_v54, %v3346_v11  ;;  %v3365_v32 = vcombine.low %v3314_v54, %v3346_v11 }
 0x715   : > { %3389 = vrot.lane.b32.xlu0 %v3230_v43, %s4406_s3  ;;  %v3019_v25 = vrot.slane %v3011_v59, %v5027_v61  ;;  %v3026_v14 = vrot.slane %v3012_v13, %v5027_v61 }
 0x716   : > { %3375 = vrot.lane.b32.xlu1 %v3364_v40, %s4405_s0 }
 0x719   : > { %3391 = vrot.lane.b32.xlu0 %v3366_v23, %s4406_s3 }
 0x71a   : > { %3383 = vrot.lane.b32.xlu1 %v3365_v32, %s4404_s20 }
 0x72e   : > { %v2779_v10 = vpop.trf.xlu1 }
 0x72f   : > { %v2859_v30 = vcombine.low %v2715_v62, %v2779_v10  ;;  %v2860_v37 = vcombine.high %v2715_v62, %v2779_v10 }
 0x731   : > { %v2867_v0 = vrot.slane %v2859_v30, %v5027_v61  ;;  %v2874_v41 = vrot.slane %v2860_v37, %v5027_v61 }
 0x732   : > { %v2780_v44 = vpop.trf.xlu1 }
 0x733   : > { %v2923_v18 = vcombine.low %v2867_v0, %v2883_v38  ;;  %v2924_v35 = vcombine.high %v2867_v0, %v2883_v38  ;;  %v2939_v2 = vcombine.low %v2874_v41, %v2890_v39  ;;  %v2940_v21 = vcombine.high %v2874_v41, %v2890_v39 }
 0x734   : > { %v2995_v46 = vcombine.low %v2716_v57, %v2780_v44  ;;  %v2996_v49 = vcombine.high %v2716_v57, %v2780_v44 }
 0x735   : > { %v2931_v24 = vrot.slane %v2923_v18, %v5031_v28  ;;  %v2938_v1 = vrot.slane %v2924_v35, %v5031_v28  ;;  %v2947_v29 = vrot.slane %v2939_v2, %v5031_v28  ;;  %v2954_v50 = vrot.slane %v2940_v21, %v5031_v28 }
 0x736   : > { %v3003_v45 = vrot.slane %v2995_v46, %v5027_v61  ;;  %v3010_v48 = vrot.slane %v2996_v49, %v5027_v61  ;;  %v4188_v49 = vld [vmem:[%s5194_s4] ss:$0 sm:$0xff] }
 0x737   : > { %v3747_v19 = vcombine.low %v2931_v24, %v2938_v1  ;;  %v3749_v31 = vcombine.high %v2931_v24, %v2938_v1  ;;  %v3751_v26 = vcombine.low %v2947_v29, %v2954_v50  ;;  %v3753_v52 = vcombine.high %v2947_v29, %v2954_v50 }
 0x738   : > { %v3059_v53 = vcombine.low %v3003_v45, %v3019_v25  ;;  %v3060_v55 = vcombine.high %v3003_v45, %v3019_v25  ;;  %v3075_v56 = vcombine.low %v3010_v48, %v3026_v14  ;;  %v3076_v58 = vcombine.high %v3010_v48, %v3026_v14 }
 0x739   : > { %v3114_v51 = vrot.slane %v3747_v19, %v5027_v61  ;;  %v3130_v27 = vrot.slane %v3749_v31, %v5027_v61  ;;  %v3146_v3 = vrot.slane %v3751_v26, %v5027_v61  ;;  %v3162_v4 = vrot.slane %v3753_v52, %v5027_v61 }
 0x73a   : > { %v3067_v5 = vrot.slane %v3059_v53, %v5031_v28  ;;  %v3074_v63 = vrot.slane %v3060_v55, %v5031_v28  ;;  %v3083_v15 = vrot.slane %v3075_v56, %v5031_v28  ;;  %v3090_v16 = vrot.slane %v3076_v58, %v5031_v28 }
 0x73b   : > { %v3179_v20 = vcombine.low %v3114_v51, %v3130_v27  ;;  %v3211_v6 = vcombine.low %v3146_v3, %v3162_v4  ;;  %v3180_v8 = vcombine.high %v3114_v51, %v3130_v27  ;;  %v3212_v9 = vcombine.high %v3146_v3, %v3162_v4 }
 0x73c   : > { %v3755_v43 = vcombine.low %v3067_v5, %v3074_v63  ;;  %v3757_v54 = vcombine.high %v3067_v5, %v3074_v63  ;;  %v3759_v11 = vcombine.low %v3083_v15, %v3090_v16  ;;  %v3761_v40 = vcombine.high %v3083_v15, %v3090_v16 }
 0x73d   : > { %v3187_v23 = vrot.slane %v3179_v20, %v5031_v28  ;;  %v3219_v32 = vrot.slane %v3211_v6, %v5031_v28  ;;  %v3194_v39 = vrot.slane %v3180_v8, %v5031_v28  ;;  %v3226_v0 = vrot.slane %v3212_v9, %v5031_v28 }
 0x73e   : > { %v3250_v17 = vrot.slane %v3755_v43, %v5027_v61  ;;  %v3266_v62 = vrot.slane %v3757_v54, %v5027_v61  ;;  %v3282_v36 = vrot.slane %v3759_v11, %v5027_v61  ;;  %v3298_v57 = vrot.slane %v3761_v40, %v5027_v61 }
 0x73f   : > { %v3231_v7 = vcombine.low %v3187_v23, %v3219_v32  ;;  %v3232_v38 = vcombine.high %v3187_v23, %v3219_v32  ;;  %v3233_v61 = vcombine.low %v3194_v39, %v3226_v0  ;;  %v3234_v2 = vcombine.high %v3194_v39, %v3226_v0 }
 0x740   : > { %v3315_v10 = vcombine.low %v3250_v17, %v3266_v62  ;;  %v3347_v12 = vcombine.low %v3282_v36, %v3298_v57  ;;  %v3316_v59 = vcombine.high %v3250_v17, %v3266_v62  ;;  %v3348_v13 = vcombine.high %v3282_v36, %v3298_v57 }
 0x741   : > { %3397 = vrot.lane.b32.xlu1 %v3231_v7, %s4407_s29 }
 0x742   : > { %v3323_v30 = vrot.slane %v3315_v10, %v5031_v28  ;;  %v3355_v37 = vrot.slane %v3347_v12, %v5031_v28  ;;  %v3330_v18 = vrot.slane %v3316_v59, %v5031_v28  ;;  %v3362_v35 = vrot.slane %v3348_v13, %v5031_v28 }
 0x744   : > { %v3367_v41 = vcombine.low %v3323_v30, %v3355_v37  ;;  %v3368_v44 = vcombine.high %v3323_v30, %v3355_v37  ;;  %v3369_v21 = vcombine.low %v3330_v18, %v3362_v35  ;;  %v3370_v46 = vcombine.high %v3330_v18, %v3362_v35 }
 0x745   : > { %3405 = vrot.lane.b32.xlu1 %v3232_v38, %s4408_s18 }
 0x746   : > { %3399 = vrot.lane.b32.xlu0 %v3367_v41, %s4407_s29 }
 0x749   : > { %3413 = vrot.lane.b32.xlu1 %v3233_v61, %s4409_s27 }
 0x74a   : > { %3407 = vrot.lane.b32.xlu0 %v3368_v44, %s4408_s18 }
 0x74d   : > { %3421 = vrot.lane.b32.xlu1 %v3234_v2, %s4410_s13 }
 0x74e   : > { %3415 = vrot.lane.b32.xlu0 %v3369_v21, %s4409_s27 }
 0x751   : > { %3462 = vrot.lane.b32.xlu1 %v4188_v49, %s4401_s26  ;;  %s4309_s26 = sshll.u32 %s4411_s7, 4  ;;  %s4310_s26 = int_to_ptr.vmem [resolvable:$false] %s4309_s26 }
 0x752   : > { %3423 = vrot.lane.b32.xlu0 %v3370_v46, %s4410_s13  ;;  %s4311_s0 = scalar_lea.vmem %s4310_s26, 512  ;;  %p4312_p4 = scmp.lt.s32.totalorder %s5138_s12, %s4310_s26 }
 0x753   : > { %p4313_p5 = scmp.lt.s32.totalorder %s4311_s0, %s4305_s25 }
 0x755   : > { %p4314_p3 = por %p4313_p5, %p4312_p4 }
 0x757   : > { %p4315_p7 = pnand %p4314_p3, %p4308_p10 }
 0x783   : > { %v3382_v24 = vpop.permute.xlu1 %3381  ;;  %v3374_v1 = vpop.permute.xlu0 %3373 }
 0x784   : > { %v3427_v48 = vsel %vm824_vm2, %v3227_v22, %v3374_v1 }
 0x785   : > { %v3429_v31 = vsel %vm1482_vm4, %v3427_v48, %v3382_v24 }
 0x787   : > { %v3390_v28 = vpop.permute.xlu0 %3389 }
 0x788   : > { %v3376_v29 = vpop.permute.xlu1 %3375  ;;  %v3432_v52 = vsel %vm3431_vm6, %v3429_v31, %v3390_v28 }
 0x789   : > { %v3428_v55 = vsel %vm824_vm2, %v3363_v33, %v3376_v29 }
 0x78b   : > { %v3392_v14 = vpop.permute.xlu0 %3391 }
 0x78c   : > { %v3384_v50 = vpop.permute.xlu1 %3383 }
 0x78d   : > { %v3430_v34 = vsel %vm1482_vm4, %v3428_v55, %v3384_v50 }
 0x78e   : > { %v3433_v3 = vsel %vm3431_vm6, %v3430_v34, %v3392_v14 }
 0x7b3   : > { %v3398_v25 = vpop.permute.xlu1 %3397 }
 0x7b4   : > { %v3435_v60 = vsel %vm3434_vm7, %v3432_v52, %v3398_v25 }
 0x7b7   : > { %v3406_v45 = vpop.permute.xlu1 %3405 }
 0x7b8   : > { %v3400_v19 = vpop.permute.xlu0 %3399  ;;  %v3438_v22 = vsel %vm3437_vm8, %v3435_v60, %v3406_v45 }
 0x7b9   : > { %v3436_v47 = vsel %vm3434_vm7, %v3433_v3, %v3400_v19 }
 0x7bb   : > { %v3414_v26 = vpop.permute.xlu1 %3413 }
 0x7bc   : > { %v3408_v53 = vpop.permute.xlu0 %3407  ;;  %v3441_v56 = vsel %vm3440_vm9, %v3438_v22, %v3414_v26 }
 0x7bd   : > { %v3439_v42 = vsel %vm3437_vm8, %v3436_v47, %v3408_v53 }
 0x7bf   : > { %v3422_v58 = vpop.permute.xlu1 %3421 }
 0x7c0   : > { %v3444_v51 = vsel %vm3443_vm10, %v3441_v56, %v3422_v58  ;;  %v3416_v27 = vpop.permute.xlu0 %3415 }
 0x7c1   : > { %3962 = vmatprep.mubr.msk.f32.mxu0 %vm355_vm1, %v3444_v51  ;;  %v3442_v33 = vsel %vm3440_vm9, %v3439_v42, %v3416_v27 }
 0x7c3   : > { %v3463_v63 = vpop.permute.xlu1 %3462 }
 0x7c4   : > { %v3424_v4 = vpop.permute.xlu0 %3423 }
 0x7c5   : > { %v3445_v5 = vsel %vm3443_vm10, %v3442_v33, %v3424_v4 }
 0x7c6   : > { %3963 = vmatmul.mubr.msk.f32.vlgmr.msra.gmra.mrb[16].mxu0 %vm355_vm1, %v3445_v5 }
 0x899   : > { %v3964_v15 = vpop.f32.mrb[16].mxu0 }
 0x89a   : > { %v3543_v16 = vadd.f32 %v3964_v15, %v3463_v63  ;;  %v3537_v20 = vpop.f32.mrb[17].mxu0 }
 0x89b   : > { %v3538_v6 = vadd.f32 %v3537_v20, %v3463_v63 }
 0x89c   : > { %3547 = vst.msk [vmem:[%s335_s17 + $0x8] sm:$0xff] %vm355_vm1, %v3543_v16 }
 0x89d   : > { %3546 = vst.msk [vmem:[%s335_s17] sm:$0xff] %vm355_vm1, %v3538_v6 }
 0x89e   : > { %4318 = shalt.err (!%p4315_p7)
}
 0x89f   : > { %s4319_s3 = scalar_lea.hbm %s5143_s15, 256  ;;  %s4323_s27 = scalar_lea.hbm %s5196_s6, 512 }
 0x8a0   : > { %p4320_p2 = scmp.ne.s32.totalorder %s5143_s15, %s4319_s3  ;;  %p4324_p0 = scmp.lt.u32.totalorder %s5143_s15, %s5196_s6 }
 0x8a1   : > { %p4325_p9 = scmp.lt.u32.totalorder %s4323_s27, %s4319_s3  ;;  %p4327_p1 = scmp.lt.u32.totalorder %s4319_s3, %s5143_s15 }
 0x8a2   : > { %p4321_p8 = pnand %p4320_p2, %p5228_p13 }
 0x8a3   : > { %p4326_p12 = por %p4325_p9, %p4324_p0 }
 0x8a4   : > { %p4322_p11 = pneg %p4321_p8 }
 0x8a5   : > { %p4328_p6 = por %p4327_p1, %p4326_p12 }
 0x8a7   : > { %p4329_p10 = pnand %p4328_p6, %p4322_p11 }
 0x8a9   : > { %4332 = shalt.err (!%p4329_p10)
}
 0x8aa   : > { %s4412_s16 = smov 128  }
 0x8ab   : > { %4031 = dma.vmem_to_hbm [thread:$0]  (%p5228_p13), %s5138_s12, 256, %s5143_s15, %s3549_s10, %s4412_s16, %s4412_s16, %s4404_s20  }
 0x8ac PF: > { %s3577_s17 = sand.u32 1, %s4371_s21   ;;  %p5229_p4 = scmp.ne.s32.totalorder %s5207_s28, 0 }
 0x8ad   : > { %p5230_p5 = scmp.ge.s32.totalorder %s4383_s24, 2  ;;  %s3578_s14 = scalar_lea.sflag [#allocation4], %s3577_s17 }
 0x8af   : > { %p4048_p3 = pnand %p5230_p5, %p5229_p4 }
 0x8b1   : > { %4366 = dma.done.wait (!%p4048_p3), %s3578_s14, 256  }
 0x8b2   : > { %4368 = vsyncadd (!%p4048_p3), %s3578_s14, 4294967040  ;;  %s5231_s9 = sld [smem:[#allocation16_spill]]  ;;  %p23_p7 = scmp.ge.s32.totalorder %s4564_s8, 4  }
 0x8b3   : > { %s5232_s21 = smov %s4375_s22  ;;  %s5233_s22 = smov %s4379_s23 }
 0x8b4   : > { %s5235_s24 = smov %s4564_s8  ;;  %25 = sbr.rel (!%p23_p7) target bundleno = 12 (0xc), region = 110 }
 0x8b8   : > { %s5234_s23 = smov %s5231_s9 }
 0x8bb   :  { %3583 = vsyncpa [#allocation3], 1 }
 0x8bc   :  { %3585 = vsyncpa [#allocation3 + $0x1], 1 }
 0x8bd   :  { %3586 = vsyncpa [#allocation6], 1 }
 0x8be   :  { %3588 = vsyncpa [#allocation6 + $0x1], 1 }
 0x8bf   :  { %3589 = vsyncpa [#allocation9], 1 }
 0x8c0   :  { %3590 = vsyncpa [#allocation4], 1 }
 0x8c1   :  { %3592 = vsyncpa [#allocation4 + $0x1], 1 }

</bundles_post_ra>
